<compile_context>
chip_gen: v7x
topology: tpu7x:2x2x1
jax: 0.10.0
libtpu: 0.0.40
codegen_flags: <defaults>
</compile_context>

<pallas_src>
import functools

import jax
import jax.numpy as jnp
import numpy as np
from jax import lax
from jax.experimental import pallas as pl
from jax.experimental.pallas import tpu as pltpu

LATENT = 4       # latent_length
HIDDEN = 64      # hidden_size
SEQ_LEN = 5      # sequence_length
DEPTH = 2        # hidden_layer_depth (kernel hard-codes the 2-layer GRU stack)
OUT_SIZE = 1     # output_size
LANE_OUT = 128   # lane-dense output width (>= SEQ_LEN, multiple of 128)


# ----------------------------------------------------------------------------
# Pallas kernel
# ----------------------------------------------------------------------------
def _decoder_kernel(seq_len, hidden,
                    z_ref, wl2h_ref, bl2h_ref,
                    whh0_ref, bhh0f_ref, bih0n_ref,
                    wih1_ref, bih1f_ref, whh1_ref, bhh1n_ref,
                    whobd_ref, bho_ref,
                    out_ref):
    H = hidden
    H2 = 2 * H

    z = z_ref[...]                                   # (B, L)
    B, L = z.shape

    # latent_to_hidden on the VPU: K=4 broadcast-FMA terms (far below MXU granularity).
    h_state = bl2h_ref[...] + z[:, 0:1] * wl2h_ref[0:1, :]
    for k in range(1, L):
        h_state = h_state + z[:, k:k + 1] * wl2h_ref[k:k + 1, :]

    # h_0 = stack([h_state, h_state]): both GRU layers start from h_state.
    h0 = h_state
    h1 = h_state

    h1_steps = []
    for _ in range(seq_len):                         # static unroll, seq_len == 5
        # ---- layer 0: decoder inputs are zero, so the input gates reduce to bih0;
        #      its r/z part is pre-folded into bhh0f, the n part is bih0n. ----
        hg0 = jnp.dot(h0, whh0_ref[...],
                      preferred_element_type=jnp.float32) + bhh0f_ref[...]   # (B, 3H)
        rz0 = jax.nn.sigmoid(hg0[:, :H2])            # one full-128-lane sigmoid
        r0 = rz0[:, :H]
        z0 = rz0[:, H:]
        n0 = jnp.tanh(bih0n_ref[...] + r0 * hg0[:, H2:])
        h0 = (1.0 - z0) * n0 + z0 * h0

        # ---- layer 1: input = layer-0 hidden; bhh1's r/z part is pre-folded into
        #      bih1f, its n part is bhh1n. ----
        xg1 = jnp.dot(h0, wih1_ref[...],
                      preferred_element_type=jnp.float32) + bih1f_ref[...]   # (B, 3H)
        hg1 = jnp.dot(h1, whh1_ref[...],
                      preferred_element_type=jnp.float32)                    # (B, 3H)
        rz1 = jax.nn.sigmoid(xg1[:, :H2] + hg1[:, :H2])
        r1 = rz1[:, :H]
        z1 = rz1[:, H:]
        n1 = jnp.tanh(xg1[:, H2:] + r1 * (hg1[:, H2:] + bhh1n_ref[...]))
        h1 = (1.0 - z1) * n1 + z1 * h1

        h1_steps.append(h1)

    # Deferred hidden_to_output: one (B, T*H) @ (T*H, 128) block-diagonal matmul +
    # one sigmoid + one lane-dense store, instead of T matmuls with N=1 and a
    # lane concat of width-1 columns.
    h_cat = jnp.concatenate(h1_steps, axis=1)        # (B, T*H)
    out = jax.nn.sigmoid(
        jnp.dot(h_cat, whobd_ref[...], preferred_element_type=jnp.float32)
        + bho_ref[...])                              # (B, 128)
    out_ref[...] = out


# ----------------------------------------------------------------------------
# Parameter packing (done once; keeps per-call work minimal).
# ----------------------------------------------------------------------------
def pack_params(params, *, seq_len=SEQ_LEN, hidden=HIDDEN, lane=LANE_OUT):
    (wl2h, bl2h,
     wih0, whh0, bih0, bhh0,          # wih0 unused: decoder inputs are identically zero
     wih1, whh1, bih1, bhh1,
     who, bho) = params
    del wih0
    H = hidden
    H2 = 2 * H
    f32 = jnp.float32

    wl2h_t = wl2h.T.astype(f32)                                        # (L, H)
    bl2h_r = bl2h.astype(f32)[None, :]                                 # (1, H)

    whh0_t = whh0.T.astype(f32)                                        # (H, 3H)
    bhh0f = jnp.concatenate([bhh0[:H2] + bih0[:H2], bhh0[H2:]]).astype(f32)[None, :]
    bih0n = bih0[H2:].astype(f32)[None, :]                             # (1, H)

    wih1_t = wih1.T.astype(f32)                                        # (H, 3H)
    bih1f = jnp.concatenate([bih1[:H2] + bhh1[:H2], bih1[H2:]]).astype(f32)[None, :]
    whh1_t = whh1.T.astype(f32)                                        # (H, 3H)
    bhh1n = bhh1[H2:].astype(f32)[None, :]                             # (1, H)

    # Block-diagonal output projection: column t holds who for time-step t.
    who_bd = jnp.kron(jnp.eye(seq_len, lane, dtype=f32),
                      who.reshape(H, 1).astype(f32))                   # (T*H, lane)
    bho_r = jnp.full((1, lane), bho.astype(f32)[0])                    # (1, lane)

    # TODO(synk): on v6e/v7x the (H,3H)/(T*H,lane) weights could be cast to bf16
    # (f32 accumulation via preferred_element_type) to halve weight DMA bytes.
    return (wl2h_t, bl2h_r, whh0_t, bhh0f, bih0n,
            wih1_t, bih1f, whh1_t, bhh1n, who_bd, bho_r)


# ----------------------------------------------------------------------------
# Wrapper: batch grid (parallel -> megacore on v7x), lane-dense output.
# ----------------------------------------------------------------------------
@functools.partial(jax.jit, static_argnames=("seq_len", "hidden", "max_batch_block"))
def decoder_forward(z, packed, *, seq_len=SEQ_LEN, hidden=HIDDEN, max_batch_block=256):
    assert max_batch_block % 8 == 0
    B, latent = z.shape
    lane = packed[-1].shape[-1]

    if B <= max_batch_block:
        b_blk, b_pad = B, B                          # single grid step, block == full
    else:
        b_blk = max_batch_block                      # multiple of 8 -> valid sublane tile
        b_pad = pl.cdiv(B, b_blk) * b_blk

    zin = z.astype(jnp.float32)
    if b_pad != B:
        zin = jnp.pad(zin, ((0, b_pad - B), (0, 0)))

    grid = (b_pad // b_blk,)
    in_specs = [pl.BlockSpec((b_blk, latent), lambda i: (i, 0))]
    # Weights: constant block index -> DMA'd once, stay resident across grid steps.
    in_specs += [pl.BlockSpec(w.shape, lambda i: (0, 0)) for w in packed]
    out_specs = pl.BlockSpec((b_blk, lane), lambda i: (i, 0))

    kernel = functools.partial(_decoder_kernel, seq_len, hidden)
    out = pl.pallas_call(
        kernel,
        out_shape=jax.ShapeDtypeStruct((b_pad, lane), jnp.float32),
        grid=grid,
        in_specs=in_specs,
        out_specs=out_specs,
        compiler_params=pltpu.CompilerParams(dimension_semantics=("parallel",)),
    )(zin, *packed)
    return out[:B, :seq_len]                         # (B, T)


# ----------------------------------------------------------------------------
# Pure-JAX reference (mirrors torch nn.GRU / nn.Linear semantics).
# ----------------------------------------------------------------------------
def decoder_reference(z, params, *, seq_len=SEQ_LEN, hidden=HIDDEN):
    (wl2h, bl2h, wih0, whh0, bih0, bhh0,
     wih1, whh1, bih1, bhh1, who, bho) = params
    H = hidden
    B = z.shape[0]
    # HIGHEST precision here to match the kernel's exact-f32 VPU latent projection
    # (torch itself uses float64 for this module).
    h_state = jnp.dot(z, wl2h.T, precision=lax.Precision.HIGHEST) + bl2h
    h0 = h_state
    h1 = h_state

    def cell(x, h, wih, whh, bih, bhh):
        gi = x @ wih.T + bih
        gh = h @ whh.T + bhh
        r = jax.nn.sigmoid(gi[:, :H] + gh[:, :H])
        zz = jax.nn.sigmoid(gi[:, H:2 * H] + gh[:, H:2 * H])
        n = jnp.tanh(gi[:, 2 * H:] + r * gh[:, 2 * H:])
        return (1.0 - zz) * n + zz * h

    x0 = jnp.zeros((B, 1), jnp.float32)
    outs = []
    for _ in range(seq_len):
        h0 = cell(x0, h0, wih0, whh0, bih0, bhh0)
        h1 = cell(h0, h1, wih1, whh1, bih1, bhh1)
        outs.append(jax.nn.sigmoid(h1 @ who.T + bho))
    out = jnp.stack(outs, axis=0)                    # (T, B, 1)
    return jnp.transpose(out, (1, 0, 2))[..., 0]     # (B, T) == permute(1,0,2).squeeze()


# ----------------------------------------------------------------------------
# Deterministic parameter init (shapes from the module's __init__).
# ----------------------------------------------------------------------------
def init_params(key, latent=LATENT, hidden=HIDDEN, out_size=OUT_SIZE):
    ks = jax.random.split(key, 16)
    H = hidden

    def xavier(k, shape):
        fan_out, fan_in = shape
        a = float(np.sqrt(6.0 / (fan_in + fan_out)))
        return jax.random.uniform(k, shape, jnp.float32, -a, a)

    def uni(k, shape, fan):
        a = 1.0 / float(np.sqrt(fan))
        return jax.random.uniform(k, shape, jnp.float32, -a, a)

    wl2h = xavier(ks[0], (H, latent))           # latent_to_hidden.weight
    bl2h = uni(ks[1], (H,), latent)             # latent_to_hidden.bias
    # GRU layer 0 (input_size=1)
    wih0 = uni(ks[2], (3 * H, 1), H)
    whh0 = uni(ks[3], (3 * H, H), H)
    bih0 = uni(ks[4], (3 * H,), H)
    bhh0 = uni(ks[5], (3 * H,), H)
    # GRU layer 1 (input_size=H)
    wih1 = uni(ks[6], (3 * H, H), H)
    whh1 = uni(ks[7], (3 * H, H), H)
    bih1 = uni(ks[8], (3 * H,), H)
    bhh1 = uni(ks[9], (3 * H,), H)
    # hidden_to_output
    who = xavier(ks[10], (out_size, H))
    bho = uni(ks[11], (out_size,), H)
    return (wl2h, bl2h, wih0, whh0, bih0, bhh0,
            wih1, whh1, bih1, bhh1, who, bho)


if __name__ == "__main__":
    key = jax.random.PRNGKey(0)
    pkey, zkey, zkey2 = jax.random.split(key, 3)
    params = init_params(pkey)
    packed = pack_params(params)

    # Small case matching the module defaults (batch 2, latent 4): single grid step.
    B = 2
    z = jax.random.normal(zkey, (B, LATENT), jnp.float32)
    out = jax.block_until_ready(decoder_forward(z, packed))
    ref = decoder_reference(z, params)
    np.testing.assert_allclose(np.asarray(out), np.asarray(ref), rtol=1e-4, atol=1e-4)
    assert out.shape == (B, SEQ_LEN)

    # Larger batch exercising the batch grid / padding path (parallel axis shards
    # across the 2 TensorCores on v7x).
    B2 = 300
    z2 = jax.random.normal(zkey2, (B2, LATENT), jnp.float32)
    out2 = jax.block_until_ready(decoder_forward(z2, packed, max_batch_block=128))
    ref2 = decoder_reference(z2, params)
    np.testing.assert_allclose(np.asarray(out2), np.asarray(ref2), rtol=1e-4, atol=1e-4)
    assert out2.shape == (B2, SEQ_LEN)

    print("KERNEL_OK")
</pallas_src>

<mosaic_0001>
module attributes {stable_mosaic.version = 11 : i64} {
  func.func @_decoder_kernel(%arg0: i32, %arg1: memref<2x4xf32, #tpu.memory_space<vmem>>, %arg2: memref<4x64xf32, #tpu.memory_space<vmem>>, %arg3: memref<1x64xf32, #tpu.memory_space<vmem>>, %arg4: memref<64x192xf32, #tpu.memory_space<vmem>>, %arg5: memref<1x192xf32, #tpu.memory_space<vmem>>, %arg6: memref<1x64xf32, #tpu.memory_space<vmem>>, %arg7: memref<64x192xf32, #tpu.memory_space<vmem>>, %arg8: memref<1x192xf32, #tpu.memory_space<vmem>>, %arg9: memref<64x192xf32, #tpu.memory_space<vmem>>, %arg10: memref<1x64xf32, #tpu.memory_space<vmem>>, %arg11: memref<320x128xf32, #tpu.memory_space<vmem>>, %arg12: memref<1x128xf32, #tpu.memory_space<vmem>>, %arg13: memref<2x128xf32, #tpu.memory_space<vmem>>) attributes {dimension_semantics = [#tpu.dimension_semantics<parallel>], iteration_bounds = array<i64: 1>, scalar_prefetch = 0 : i64, scratch_operands = 0 : i64, tpu.core_type = #tpu.core_type<tc>, window_params = [{transform_indices = @transform_0, window_bounds = array<i64: 2, 4>}, {pipeline_mode = #tpu.pipeline_mode<synchronous>, transform_indices = @transform_1, window_bounds = array<i64: 4, 64>}, {pipeline_mode = #tpu.pipeline_mode<synchronous>, transform_indices = @transform_2, window_bounds = array<i64: 1, 64>}, {pipeline_mode = #tpu.pipeline_mode<synchronous>, transform_indices = @transform_3, window_bounds = array<i64: 64, 192>}, {pipeline_mode = #tpu.pipeline_mode<synchronous>, transform_indices = @transform_4, window_bounds = array<i64: 1, 192>}, {pipeline_mode = #tpu.pipeline_mode<synchronous>, transform_indices = @transform_5, window_bounds = array<i64: 1, 64>}, {pipeline_mode = #tpu.pipeline_mode<synchronous>, transform_indices = @transform_6, window_bounds = array<i64: 64, 192>}, {pipeline_mode = #tpu.pipeline_mode<synchronous>, transform_indices = @transform_7, window_bounds = array<i64: 1, 192>}, {pipeline_mode = #tpu.pipeline_mode<synchronous>, transform_indices = @transform_8, window_bounds = array<i64: 64, 192>}, {pipeline_mode = #tpu.pipeline_mode<synchronous>, transform_indices = @transform_9, window_bounds = array<i64: 1, 64>}, {pipeline_mode = #tpu.pipeline_mode<synchronous>, transform_indices = @transform_10, window_bounds = array<i64: 320, 128>}, {pipeline_mode = #tpu.pipeline_mode<synchronous>, transform_indices = @transform_11, window_bounds = array<i64: 1, 128>}, {transform_indices = @transform_12, window_bounds = array<i64: 2, 128>}]} {
    %c0 = arith.constant 0 : index
    %c0_0 = arith.constant 0 : index
    %0 = vector.load %arg1[%c0, %c0_0] : memref<2x4xf32, #tpu.memory_space<vmem>>, vector<2x4xf32>
    %c0_1 = arith.constant 0 : index
    %c0_2 = arith.constant 0 : index
    %1 = vector.load %arg3[%c0_1, %c0_2] : memref<1x64xf32, #tpu.memory_space<vmem>>, vector<1x64xf32>
    %2 = vector.extract_strided_slice %0 {offsets = [0, 0], sizes = [2, 1], strides = [1, 1]} : vector<2x4xf32> to vector<2x1xf32>
    %c0_3 = arith.constant 0 : index
    %c0_4 = arith.constant 0 : index
    %3 = vector.load %arg2[%c0_3, %c0_4] : memref<4x64xf32, #tpu.memory_space<vmem>>, vector<1x64xf32>
    %4 = vector.broadcast %2 : vector<2x1xf32> to vector<2x64xf32>
    %5 = vector.broadcast %3 : vector<1x64xf32> to vector<2x64xf32>
    %6 = arith.mulf %4, %5 : vector<2x64xf32>
    %7 = vector.broadcast %1 : vector<1x64xf32> to vector<2x64xf32>
    %8 = arith.addf %7, %6 : vector<2x64xf32>
    %9 = vector.extract_strided_slice %0 {offsets = [0, 1], sizes = [2, 1], strides = [1, 1]} : vector<2x4xf32> to vector<2x1xf32>
    %c1 = arith.constant 1 : index
    %c0_5 = arith.constant 0 : index
    %10 = vector.load %arg2[%c1, %c0_5] : memref<4x64xf32, #tpu.memory_space<vmem>>, vector<1x64xf32>
    %11 = vector.broadcast %9 : vector<2x1xf32> to vector<2x64xf32>
    %12 = vector.broadcast %10 : vector<1x64xf32> to vector<2x64xf32>
    %13 = arith.mulf %11, %12 : vector<2x64xf32>
    %14 = arith.addf %8, %13 : vector<2x64xf32>
    %15 = vector.extract_strided_slice %0 {offsets = [0, 2], sizes = [2, 1], strides = [1, 1]} : vector<2x4xf32> to vector<2x1xf32>
    %c2 = arith.constant 2 : index
    %c0_6 = arith.constant 0 : index
    %16 = vector.load %arg2[%c2, %c0_6] : memref<4x64xf32, #tpu.memory_space<vmem>>, vector<1x64xf32>
    %17 = vector.broadcast %15 : vector<2x1xf32> to vector<2x64xf32>
    %18 = vector.broadcast %16 : vector<1x64xf32> to vector<2x64xf32>
    %19 = arith.mulf %17, %18 : vector<2x64xf32>
    %20 = arith.addf %14, %19 : vector<2x64xf32>
    %21 = vector.extract_strided_slice %0 {offsets = [0, 3], sizes = [2, 1], strides = [1, 1]} : vector<2x4xf32> to vector<2x1xf32>
    %c3 = arith.constant 3 : index
    %c0_7 = arith.constant 0 : index
    %22 = vector.load %arg2[%c3, %c0_7] : memref<4x64xf32, #tpu.memory_space<vmem>>, vector<1x64xf32>
    %23 = vector.broadcast %21 : vector<2x1xf32> to vector<2x64xf32>
    %24 = vector.broadcast %22 : vector<1x64xf32> to vector<2x64xf32>
    %25 = arith.mulf %23, %24 : vector<2x64xf32>
    %26 = arith.addf %20, %25 : vector<2x64xf32>
    %c0_8 = arith.constant 0 : index
    %c0_9 = arith.constant 0 : index
    %27 = vector.load %arg4[%c0_8, %c0_9] : memref<64x192xf32, #tpu.memory_space<vmem>>, vector<64x192xf32>
    %cst = arith.constant dense<0.000000e+00> : vector<2x192xf32>
    %28 = tpu.matmul %26, %27, %cst {dimension_numbers = #tpu.dot_dimension_numbers<[1], [0], [0], [1], [0, 0, 1, 1], [], []>} : vector<2x64xf32>, vector<64x192xf32>, vector<2x192xf32> -> vector<2x192xf32>
    %c0_10 = arith.constant 0 : index
    %c0_11 = arith.constant 0 : index
    %29 = vector.load %arg5[%c0_10, %c0_11] : memref<1x192xf32, #tpu.memory_space<vmem>>, vector<1x192xf32>
    %30 = vector.broadcast %29 : vector<1x192xf32> to vector<2x192xf32>
    %31 = arith.addf %28, %30 : vector<2x192xf32>
    %32 = vector.extract_strided_slice %31 {offsets = [0, 0], sizes = [2, 128], strides = [1, 1]} : vector<2x192xf32> to vector<2x128xf32>
    %33 = arith.negf %32 : vector<2x128xf32>
    %34 = math.exp %33 : vector<2x128xf32>
    %cst_12 = arith.constant 1.000000e+00 : f32
    %35 = vector.broadcast %cst_12 : f32 to vector<2x128xf32>
    %36 = arith.addf %35, %34 : vector<2x128xf32>
    %37 = arith.divf %35, %36 : vector<2x128xf32>
    %38 = vector.extract_strided_slice %37 {offsets = [0, 0], sizes = [2, 64], strides = [1, 1]} : vector<2x128xf32> to vector<2x64xf32>
    %39 = vector.extract_strided_slice %37 {offsets = [0, 64], sizes = [2, 64], strides = [1, 1]} : vector<2x128xf32> to vector<2x64xf32>
    %c0_13 = arith.constant 0 : index
    %c0_14 = arith.constant 0 : index
    %40 = vector.load %arg6[%c0_13, %c0_14] : memref<1x64xf32, #tpu.memory_space<vmem>>, vector<1x64xf32>
    %41 = vector.extract_strided_slice %31 {offsets = [0, 128], sizes = [2, 64], strides = [1, 1]} : vector<2x192xf32> to vector<2x64xf32>
    %42 = arith.mulf %38, %41 : vector<2x64xf32>
    %43 = vector.broadcast %40 : vector<1x64xf32> to vector<2x64xf32>
    %44 = arith.addf %43, %42 : vector<2x64xf32>
    %45 = math.tanh %44 : vector<2x64xf32>
    %cst_15 = arith.constant 1.000000e+00 : f32
    %46 = vector.broadcast %cst_15 : f32 to vector<2x64xf32>
    %47 = arith.subf %46, %39 : vector<2x64xf32>
    %48 = arith.mulf %47, %45 : vector<2x64xf32>
    %49 = arith.mulf %39, %26 : vector<2x64xf32>
    %50 = arith.addf %48, %49 : vector<2x64xf32>
    %c0_16 = arith.constant 0 : index
    %c0_17 = arith.constant 0 : index
    %51 = vector.load %arg7[%c0_16, %c0_17] : memref<64x192xf32, #tpu.memory_space<vmem>>, vector<64x192xf32>
    %cst_18 = arith.constant dense<0.000000e+00> : vector<2x192xf32>
    %52 = tpu.matmul %50, %51, %cst_18 {dimension_numbers = #tpu.dot_dimension_numbers<[1], [0], [0], [1], [0, 0, 1, 1], [], []>} : vector<2x64xf32>, vector<64x192xf32>, vector<2x192xf32> -> vector<2x192xf32>
    %c0_19 = arith.constant 0 : index
    %c0_20 = arith.constant 0 : index
    %53 = vector.load %arg8[%c0_19, %c0_20] : memref<1x192xf32, #tpu.memory_space<vmem>>, vector<1x192xf32>
    %54 = vector.broadcast %53 : vector<1x192xf32> to vector<2x192xf32>
    %55 = arith.addf %52, %54 : vector<2x192xf32>
    %c0_21 = arith.constant 0 : index
    %c0_22 = arith.constant 0 : index
    %56 = vector.load %arg9[%c0_21, %c0_22] : memref<64x192xf32, #tpu.memory_space<vmem>>, vector<64x192xf32>
    %cst_23 = arith.constant dense<0.000000e+00> : vector<2x192xf32>
    %57 = tpu.matmul %26, %56, %cst_23 {dimension_numbers = #tpu.dot_dimension_numbers<[1], [0], [0], [1], [0, 0, 1, 1], [], []>} : vector<2x64xf32>, vector<64x192xf32>, vector<2x192xf32> -> vector<2x192xf32>
    %58 = vector.extract_strided_slice %55 {offsets = [0, 0], sizes = [2, 128], strides = [1, 1]} : vector<2x192xf32> to vector<2x128xf32>
    %59 = vector.extract_strided_slice %57 {offsets = [0, 0], sizes = [2, 128], strides = [1, 1]} : vector<2x192xf32> to vector<2x128xf32>
    %60 = arith.addf %58, %59 : vector<2x128xf32>
    %61 = arith.negf %60 : vector<2x128xf32>
    %62 = math.exp %61 : vector<2x128xf32>
    %cst_24 = arith.constant 1.000000e+00 : f32
    %63 = vector.broadcast %cst_24 : f32 to vector<2x128xf32>
    %64 = arith.addf %63, %62 : vector<2x128xf32>
    %65 = arith.divf %63, %64 : vector<2x128xf32>
    %66 = vector.extract_strided_slice %65 {offsets = [0, 0], sizes = [2, 64], strides = [1, 1]} : vector<2x128xf32> to vector<2x64xf32>
    %67 = vector.extract_strided_slice %65 {offsets = [0, 64], sizes = [2, 64], strides = [1, 1]} : vector<2x128xf32> to vector<2x64xf32>
    %68 = vector.extract_strided_slice %55 {offsets = [0, 128], sizes = [2, 64], strides = [1, 1]} : vector<2x192xf32> to vector<2x64xf32>
    %69 = vector.extract_strided_slice %57 {offsets = [0, 128], sizes = [2, 64], strides = [1, 1]} : vector<2x192xf32> to vector<2x64xf32>
    %c0_25 = arith.constant 0 : index
    %c0_26 = arith.constant 0 : index
    %70 = vector.load %arg10[%c0_25, %c0_26] : memref<1x64xf32, #tpu.memory_space<vmem>>, vector<1x64xf32>
    %71 = vector.broadcast %70 : vector<1x64xf32> to vector<2x64xf32>
    %72 = arith.addf %69, %71 : vector<2x64xf32>
    %73 = arith.mulf %66, %72 : vector<2x64xf32>
    %74 = arith.addf %68, %73 : vector<2x64xf32>
    %75 = math.tanh %74 : vector<2x64xf32>
    %cst_27 = arith.constant 1.000000e+00 : f32
    %76 = vector.broadcast %cst_27 : f32 to vector<2x64xf32>
    %77 = arith.subf %76, %67 : vector<2x64xf32>
    %78 = arith.mulf %77, %75 : vector<2x64xf32>
    %79 = arith.mulf %67, %26 : vector<2x64xf32>
    %80 = arith.addf %78, %79 : vector<2x64xf32>
    %c0_28 = arith.constant 0 : index
    %c0_29 = arith.constant 0 : index
    %81 = vector.load %arg4[%c0_28, %c0_29] : memref<64x192xf32, #tpu.memory_space<vmem>>, vector<64x192xf32>
    %cst_30 = arith.constant dense<0.000000e+00> : vector<2x192xf32>
    %82 = tpu.matmul %50, %81, %cst_30 {dimension_numbers = #tpu.dot_dimension_numbers<[1], [0], [0], [1], [0, 0, 1, 1], [], []>} : vector<2x64xf32>, vector<64x192xf32>, vector<2x192xf32> -> vector<2x192xf32>
    %c0_31 = arith.constant 0 : index
    %c0_32 = arith.constant 0 : index
    %83 = vector.load %arg5[%c0_31, %c0_32] : memref<1x192xf32, #tpu.memory_space<vmem>>, vector<1x192xf32>
    %84 = vector.broadcast %83 : vector<1x192xf32> to vector<2x192xf32>
    %85 = arith.addf %82, %84 : vector<2x192xf32>
    %86 = vector.extract_strided_slice %85 {offsets = [0, 0], sizes = [2, 128], strides = [1, 1]} : vector<2x192xf32> to vector<2x128xf32>
    %87 = arith.negf %86 : vector<2x128xf32>
    %88 = math.exp %87 : vector<2x128xf32>
    %cst_33 = arith.constant 1.000000e+00 : f32
    %89 = vector.broadcast %cst_33 : f32 to vector<2x128xf32>
    %90 = arith.addf %89, %88 : vector<2x128xf32>
    %91 = arith.divf %89, %90 : vector<2x128xf32>
    %92 = vector.extract_strided_slice %91 {offsets = [0, 0], sizes = [2, 64], strides = [1, 1]} : vector<2x128xf32> to vector<2x64xf32>
    %93 = vector.extract_strided_slice %91 {offsets = [0, 64], sizes = [2, 64], strides = [1, 1]} : vector<2x128xf32> to vector<2x64xf32>
    %c0_34 = arith.constant 0 : index
    %c0_35 = arith.constant 0 : index
    %94 = vector.load %arg6[%c0_34, %c0_35] : memref<1x64xf32, #tpu.memory_space<vmem>>, vector<1x64xf32>
    %95 = vector.extract_strided_slice %85 {offsets = [0, 128], sizes = [2, 64], strides = [1, 1]} : vector<2x192xf32> to vector<2x64xf32>
    %96 = arith.mulf %92, %95 : vector<2x64xf32>
    %97 = vector.broadcast %94 : vector<1x64xf32> to vector<2x64xf32>
    %98 = arith.addf %97, %96 : vector<2x64xf32>
    %99 = math.tanh %98 : vector<2x64xf32>
    %cst_36 = arith.constant 1.000000e+00 : f32
    %100 = vector.broadcast %cst_36 : f32 to vector<2x64xf32>
    %101 = arith.subf %100, %93 : vector<2x64xf32>
    %102 = arith.mulf %101, %99 : vector<2x64xf32>
    %103 = arith.mulf %93, %50 : vector<2x64xf32>
    %104 = arith.addf %102, %103 : vector<2x64xf32>
    %c0_37 = arith.constant 0 : index
    %c0_38 = arith.constant 0 : index
    %105 = vector.load %arg7[%c0_37, %c0_38] : memref<64x192xf32, #tpu.memory_space<vmem>>, vector<64x192xf32>
    %cst_39 = arith.constant dense<0.000000e+00> : vector<2x192xf32>
    %106 = tpu.matmul %104, %105, %cst_39 {dimension_numbers = #tpu.dot_dimension_numbers<[1], [0], [0], [1], [0, 0, 1, 1], [], []>} : vector<2x64xf32>, vector<64x192xf32>, vector<2x192xf32> -> vector<2x192xf32>
    %c0_40 = arith.constant 0 : index
    %c0_41 = arith.constant 0 : index
    %107 = vector.load %arg8[%c0_40, %c0_41] : memref<1x192xf32, #tpu.memory_space<vmem>>, vector<1x192xf32>
    %108 = vector.broadcast %107 : vector<1x192xf32> to vector<2x192xf32>
    %109 = arith.addf %106, %108 : vector<2x192xf32>
    %c0_42 = arith.constant 0 : index
    %c0_43 = arith.constant 0 : index
    %110 = vector.load %arg9[%c0_42, %c0_43] : memref<64x192xf32, #tpu.memory_space<vmem>>, vector<64x192xf32>
    %cst_44 = arith.constant dense<0.000000e+00> : vector<2x192xf32>
    %111 = tpu.matmul %80, %110, %cst_44 {dimension_numbers = #tpu.dot_dimension_numbers<[1], [0], [0], [1], [0, 0, 1, 1], [], []>} : vector<2x64xf32>, vector<64x192xf32>, vector<2x192xf32> -> vector<2x192xf32>
    %112 = vector.extract_strided_slice %109 {offsets = [0, 0], sizes = [2, 128], strides = [1, 1]} : vector<2x192xf32> to vector<2x128xf32>
    %113 = vector.extract_strided_slice %111 {offsets = [0, 0], sizes = [2, 128], strides = [1, 1]} : vector<2x192xf32> to vector<2x128xf32>
    %114 = arith.addf %112, %113 : vector<2x128xf32>
    %115 = arith.negf %114 : vector<2x128xf32>
    %116 = math.exp %115 : vector<2x128xf32>
    %cst_45 = arith.constant 1.000000e+00 : f32
    %117 = vector.broadcast %cst_45 : f32 to vector<2x128xf32>
    %118 = arith.addf %117, %116 : vector<2x128xf32>
    %119 = arith.divf %117, %118 : vector<2x128xf32>
    %120 = vector.extract_strided_slice %119 {offsets = [0, 0], sizes = [2, 64], strides = [1, 1]} : vector<2x128xf32> to vector<2x64xf32>
    %121 = vector.extract_strided_slice %119 {offsets = [0, 64], sizes = [2, 64], strides = [1, 1]} : vector<2x128xf32> to vector<2x64xf32>
    %122 = vector.extract_strided_slice %109 {offsets = [0, 128], sizes = [2, 64], strides = [1, 1]} : vector<2x192xf32> to vector<2x64xf32>
    %123 = vector.extract_strided_slice %111 {offsets = [0, 128], sizes = [2, 64], strides = [1, 1]} : vector<2x192xf32> to vector<2x64xf32>
    %c0_46 = arith.constant 0 : index
    %c0_47 = arith.constant 0 : index
    %124 = vector.load %arg10[%c0_46, %c0_47] : memref<1x64xf32, #tpu.memory_space<vmem>>, vector<1x64xf32>
    %125 = vector.broadcast %124 : vector<1x64xf32> to vector<2x64xf32>
    %126 = arith.addf %123, %125 : vector<2x64xf32>
    %127 = arith.mulf %120, %126 : vector<2x64xf32>
    %128 = arith.addf %122, %127 : vector<2x64xf32>
    %129 = math.tanh %128 : vector<2x64xf32>
    %cst_48 = arith.constant 1.000000e+00 : f32
    %130 = vector.broadcast %cst_48 : f32 to vector<2x64xf32>
    %131 = arith.subf %130, %121 : vector<2x64xf32>
    %132 = arith.mulf %131, %129 : vector<2x64xf32>
    %133 = arith.mulf %121, %80 : vector<2x64xf32>
    %134 = arith.addf %132, %133 : vector<2x64xf32>
    %c0_49 = arith.constant 0 : index
    %c0_50 = arith.constant 0 : index
    %135 = vector.load %arg4[%c0_49, %c0_50] : memref<64x192xf32, #tpu.memory_space<vmem>>, vector<64x192xf32>
    %cst_51 = arith.constant dense<0.000000e+00> : vector<2x192xf32>
    %136 = tpu.matmul %104, %135, %cst_51 {dimension_numbers = #tpu.dot_dimension_numbers<[1], [0], [0], [1], [0, 0, 1, 1], [], []>} : vector<2x64xf32>, vector<64x192xf32>, vector<2x192xf32> -> vector<2x192xf32>
    %c0_52 = arith.constant 0 : index
    %c0_53 = arith.constant 0 : index
    %137 = vector.load %arg5[%c0_52, %c0_53] : memref<1x192xf32, #tpu.memory_space<vmem>>, vector<1x192xf32>
    %138 = vector.broadcast %137 : vector<1x192xf32> to vector<2x192xf32>
    %139 = arith.addf %136, %138 : vector<2x192xf32>
    %140 = vector.extract_strided_slice %139 {offsets = [0, 0], sizes = [2, 128], strides = [1, 1]} : vector<2x192xf32> to vector<2x128xf32>
    %141 = arith.negf %140 : vector<2x128xf32>
    %142 = math.exp %141 : vector<2x128xf32>
    %cst_54 = arith.constant 1.000000e+00 : f32
    %143 = vector.broadcast %cst_54 : f32 to vector<2x128xf32>
    %144 = arith.addf %143, %142 : vector<2x128xf32>
    %145 = arith.divf %143, %144 : vector<2x128xf32>
    %146 = vector.extract_strided_slice %145 {offsets = [0, 0], sizes = [2, 64], strides = [1, 1]} : vector<2x128xf32> to vector<2x64xf32>
    %147 = vector.extract_strided_slice %145 {offsets = [0, 64], sizes = [2, 64], strides = [1, 1]} : vector<2x128xf32> to vector<2x64xf32>
    %c0_55 = arith.constant 0 : index
    %c0_56 = arith.constant 0 : index
    %148 = vector.load %arg6[%c0_55, %c0_56] : memref<1x64xf32, #tpu.memory_space<vmem>>, vector<1x64xf32>
    %149 = vector.extract_strided_slice %139 {offsets = [0, 128], sizes = [2, 64], strides = [1, 1]} : vector<2x192xf32> to vector<2x64xf32>
    %150 = arith.mulf %146, %149 : vector<2x64xf32>
    %151 = vector.broadcast %148 : vector<1x64xf32> to vector<2x64xf32>
    %152 = arith.addf %151, %150 : vector<2x64xf32>
    %153 = math.tanh %152 : vector<2x64xf32>
    %cst_57 = arith.constant 1.000000e+00 : f32
    %154 = vector.broadcast %cst_57 : f32 to vector<2x64xf32>
    %155 = arith.subf %154, %147 : vector<2x64xf32>
    %156 = arith.mulf %155, %153 : vector<2x64xf32>
    %157 = arith.mulf %147, %104 : vector<2x64xf32>
    %158 = arith.addf %156, %157 : vector<2x64xf32>
    %c0_58 = arith.constant 0 : index
    %c0_59 = arith.constant 0 : index
    %159 = vector.load %arg7[%c0_58, %c0_59] : memref<64x192xf32, #tpu.memory_space<vmem>>, vector<64x192xf32>
    %cst_60 = arith.constant dense<0.000000e+00> : vector<2x192xf32>
    %160 = tpu.matmul %158, %159, %cst_60 {dimension_numbers = #tpu.dot_dimension_numbers<[1], [0], [0], [1], [0, 0, 1, 1], [], []>} : vector<2x64xf32>, vector<64x192xf32>, vector<2x192xf32> -> vector<2x192xf32>
    %c0_61 = arith.constant 0 : index
    %c0_62 = arith.constant 0 : index
    %161 = vector.load %arg8[%c0_61, %c0_62] : memref<1x192xf32, #tpu.memory_space<vmem>>, vector<1x192xf32>
    %162 = vector.broadcast %161 : vector<1x192xf32> to vector<2x192xf32>
    %163 = arith.addf %160, %162 : vector<2x192xf32>
    %c0_63 = arith.constant 0 : index
    %c0_64 = arith.constant 0 : index
    %164 = vector.load %arg9[%c0_63, %c0_64] : memref<64x192xf32, #tpu.memory_space<vmem>>, vector<64x192xf32>
    %cst_65 = arith.constant dense<0.000000e+00> : vector<2x192xf32>
    %165 = tpu.matmul %134, %164, %cst_65 {dimension_numbers = #tpu.dot_dimension_numbers<[1], [0], [0], [1], [0, 0, 1, 1], [], []>} : vector<2x64xf32>, vector<64x192xf32>, vector<2x192xf32> -> vector<2x192xf32>
    %166 = vector.extract_strided_slice %163 {offsets = [0, 0], sizes = [2, 128], strides = [1, 1]} : vector<2x192xf32> to vector<2x128xf32>
    %167 = vector.extract_strided_slice %165 {offsets = [0, 0], sizes = [2, 128], strides = [1, 1]} : vector<2x192xf32> to vector<2x128xf32>
    %168 = arith.addf %166, %167 : vector<2x128xf32>
    %169 = arith.negf %168 : vector<2x128xf32>
    %170 = math.exp %169 : vector<2x128xf32>
    %cst_66 = arith.constant 1.000000e+00 : f32
    %171 = vector.broadcast %cst_66 : f32 to vector<2x128xf32>
    %172 = arith.addf %171, %170 : vector<2x128xf32>
    %173 = arith.divf %171, %172 : vector<2x128xf32>
    %174 = vector.extract_strided_slice %173 {offsets = [0, 0], sizes = [2, 64], strides = [1, 1]} : vector<2x128xf32> to vector<2x64xf32>
    %175 = vector.extract_strided_slice %173 {offsets = [0, 64], sizes = [2, 64], strides = [1, 1]} : vector<2x128xf32> to vector<2x64xf32>
    %176 = vector.extract_strided_slice %163 {offsets = [0, 128], sizes = [2, 64], strides = [1, 1]} : vector<2x192xf32> to vector<2x64xf32>
    %177 = vector.extract_strided_slice %165 {offsets = [0, 128], sizes = [2, 64], strides = [1, 1]} : vector<2x192xf32> to vector<2x64xf32>
    %c0_67 = arith.constant 0 : index
    %c0_68 = arith.constant 0 : index
    %178 = vector.load %arg10[%c0_67, %c0_68] : memref<1x64xf32, #tpu.memory_space<vmem>>, vector<1x64xf32>
    %179 = vector.broadcast %178 : vector<1x64xf32> to vector<2x64xf32>
    %180 = arith.addf %177, %179 : vector<2x64xf32>
    %181 = arith.mulf %174, %180 : vector<2x64xf32>
    %182 = arith.addf %176, %181 : vector<2x64xf32>
    %183 = math.tanh %182 : vector<2x64xf32>
    %cst_69 = arith.constant 1.000000e+00 : f32
    %184 = vector.broadcast %cst_69 : f32 to vector<2x64xf32>
    %185 = arith.subf %184, %175 : vector<2x64xf32>
    %186 = arith.mulf %185, %183 : vector<2x64xf32>
    %187 = arith.mulf %175, %134 : vector<2x64xf32>
    %188 = arith.addf %186, %187 : vector<2x64xf32>
    %c0_70 = arith.constant 0 : index
    %c0_71 = arith.constant 0 : index
    %189 = vector.load %arg4[%c0_70, %c0_71] : memref<64x192xf32, #tpu.memory_space<vmem>>, vector<64x192xf32>
    %cst_72 = arith.constant dense<0.000000e+00> : vector<2x192xf32>
    %190 = tpu.matmul %158, %189, %cst_72 {dimension_numbers = #tpu.dot_dimension_numbers<[1], [0], [0], [1], [0, 0, 1, 1], [], []>} : vector<2x64xf32>, vector<64x192xf32>, vector<2x192xf32> -> vector<2x192xf32>
    %c0_73 = arith.constant 0 : index
    %c0_74 = arith.constant 0 : index
    %191 = vector.load %arg5[%c0_73, %c0_74] : memref<1x192xf32, #tpu.memory_space<vmem>>, vector<1x192xf32>
    %192 = vector.broadcast %191 : vector<1x192xf32> to vector<2x192xf32>
    %193 = arith.addf %190, %192 : vector<2x192xf32>
    %194 = vector.extract_strided_slice %193 {offsets = [0, 0], sizes = [2, 128], strides = [1, 1]} : vector<2x192xf32> to vector<2x128xf32>
    %195 = arith.negf %194 : vector<2x128xf32>
    %196 = math.exp %195 : vector<2x128xf32>
    %cst_75 = arith.constant 1.000000e+00 : f32
    %197 = vector.broadcast %cst_75 : f32 to vector<2x128xf32>
    %198 = arith.addf %197, %196 : vector<2x128xf32>
    %199 = arith.divf %197, %198 : vector<2x128xf32>
    %200 = vector.extract_strided_slice %199 {offsets = [0, 0], sizes = [2, 64], strides = [1, 1]} : vector<2x128xf32> to vector<2x64xf32>
    %201 = vector.extract_strided_slice %199 {offsets = [0, 64], sizes = [2, 64], strides = [1, 1]} : vector<2x128xf32> to vector<2x64xf32>
    %c0_76 = arith.constant 0 : index
    %c0_77 = arith.constant 0 : index
    %202 = vector.load %arg6[%c0_76, %c0_77] : memref<1x64xf32, #tpu.memory_space<vmem>>, vector<1x64xf32>
    %203 = vector.extract_strided_slice %193 {offsets = [0, 128], sizes = [2, 64], strides = [1, 1]} : vector<2x192xf32> to vector<2x64xf32>
    %204 = arith.mulf %200, %203 : vector<2x64xf32>
    %205 = vector.broadcast %202 : vector<1x64xf32> to vector<2x64xf32>
    %206 = arith.addf %205, %204 : vector<2x64xf32>
    %207 = math.tanh %206 : vector<2x64xf32>
    %cst_78 = arith.constant 1.000000e+00 : f32
    %208 = vector.broadcast %cst_78 : f32 to vector<2x64xf32>
    %209 = arith.subf %208, %201 : vector<2x64xf32>
    %210 = arith.mulf %209, %207 : vector<2x64xf32>
    %211 = arith.mulf %201, %158 : vector<2x64xf32>
    %212 = arith.addf %210, %211 : vector<2x64xf32>
    %c0_79 = arith.constant 0 : index
    %c0_80 = arith.constant 0 : index
    %213 = vector.load %arg7[%c0_79, %c0_80] : memref<64x192xf32, #tpu.memory_space<vmem>>, vector<64x192xf32>
    %cst_81 = arith.constant dense<0.000000e+00> : vector<2x192xf32>
    %214 = tpu.matmul %212, %213, %cst_81 {dimension_numbers = #tpu.dot_dimension_numbers<[1], [0], [0], [1], [0, 0, 1, 1], [], []>} : vector<2x64xf32>, vector<64x192xf32>, vector<2x192xf32> -> vector<2x192xf32>
    %c0_82 = arith.constant 0 : index
    %c0_83 = arith.constant 0 : index
    %215 = vector.load %arg8[%c0_82, %c0_83] : memref<1x192xf32, #tpu.memory_space<vmem>>, vector<1x192xf32>
    %216 = vector.broadcast %215 : vector<1x192xf32> to vector<2x192xf32>
    %217 = arith.addf %214, %216 : vector<2x192xf32>
    %c0_84 = arith.constant 0 : index
    %c0_85 = arith.constant 0 : index
    %218 = vector.load %arg9[%c0_84, %c0_85] : memref<64x192xf32, #tpu.memory_space<vmem>>, vector<64x192xf32>
    %cst_86 = arith.constant dense<0.000000e+00> : vector<2x192xf32>
    %219 = tpu.matmul %188, %218, %cst_86 {dimension_numbers = #tpu.dot_dimension_numbers<[1], [0], [0], [1], [0, 0, 1, 1], [], []>} : vector<2x64xf32>, vector<64x192xf32>, vector<2x192xf32> -> vector<2x192xf32>
    %220 = vector.extract_strided_slice %217 {offsets = [0, 0], sizes = [2, 128], strides = [1, 1]} : vector<2x192xf32> to vector<2x128xf32>
    %221 = vector.extract_strided_slice %219 {offsets = [0, 0], sizes = [2, 128], strides = [1, 1]} : vector<2x192xf32> to vector<2x128xf32>
    %222 = arith.addf %220, %221 : vector<2x128xf32>
    %223 = arith.negf %222 : vector<2x128xf32>
    %224 = math.exp %223 : vector<2x128xf32>
    %cst_87 = arith.constant 1.000000e+00 : f32
    %225 = vector.broadcast %cst_87 : f32 to vector<2x128xf32>
    %226 = arith.addf %225, %224 : vector<2x128xf32>
    %227 = arith.divf %225, %226 : vector<2x128xf32>
    %228 = vector.extract_strided_slice %227 {offsets = [0, 0], sizes = [2, 64], strides = [1, 1]} : vector<2x128xf32> to vector<2x64xf32>
    %229 = vector.extract_strided_slice %227 {offsets = [0, 64], sizes = [2, 64], strides = [1, 1]} : vector<2x128xf32> to vector<2x64xf32>
    %230 = vector.extract_strided_slice %217 {offsets = [0, 128], sizes = [2, 64], strides = [1, 1]} : vector<2x192xf32> to vector<2x64xf32>
    %231 = vector.extract_strided_slice %219 {offsets = [0, 128], sizes = [2, 64], strides = [1, 1]} : vector<2x192xf32> to vector<2x64xf32>
    %c0_88 = arith.constant 0 : index
    %c0_89 = arith.constant 0 : index
    %232 = vector.load %arg10[%c0_88, %c0_89] : memref<1x64xf32, #tpu.memory_space<vmem>>, vector<1x64xf32>
    %233 = vector.broadcast %232 : vector<1x64xf32> to vector<2x64xf32>
    %234 = arith.addf %231, %233 : vector<2x64xf32>
    %235 = arith.mulf %228, %234 : vector<2x64xf32>
    %236 = arith.addf %230, %235 : vector<2x64xf32>
    %237 = math.tanh %236 : vector<2x64xf32>
    %cst_90 = arith.constant 1.000000e+00 : f32
    %238 = vector.broadcast %cst_90 : f32 to vector<2x64xf32>
    %239 = arith.subf %238, %229 : vector<2x64xf32>
    %240 = arith.mulf %239, %237 : vector<2x64xf32>
    %241 = arith.mulf %229, %188 : vector<2x64xf32>
    %242 = arith.addf %240, %241 : vector<2x64xf32>
    %c0_91 = arith.constant 0 : index
    %c0_92 = arith.constant 0 : index
    %243 = vector.load %arg4[%c0_91, %c0_92] : memref<64x192xf32, #tpu.memory_space<vmem>>, vector<64x192xf32>
    %cst_93 = arith.constant dense<0.000000e+00> : vector<2x192xf32>
    %244 = tpu.matmul %212, %243, %cst_93 {dimension_numbers = #tpu.dot_dimension_numbers<[1], [0], [0], [1], [0, 0, 1, 1], [], []>} : vector<2x64xf32>, vector<64x192xf32>, vector<2x192xf32> -> vector<2x192xf32>
    %c0_94 = arith.constant 0 : index
    %c0_95 = arith.constant 0 : index
    %245 = vector.load %arg5[%c0_94, %c0_95] : memref<1x192xf32, #tpu.memory_space<vmem>>, vector<1x192xf32>
    %246 = vector.broadcast %245 : vector<1x192xf32> to vector<2x192xf32>
    %247 = arith.addf %244, %246 : vector<2x192xf32>
    %248 = vector.extract_strided_slice %247 {offsets = [0, 0], sizes = [2, 128], strides = [1, 1]} : vector<2x192xf32> to vector<2x128xf32>
    %249 = arith.negf %248 : vector<2x128xf32>
    %250 = math.exp %249 : vector<2x128xf32>
    %cst_96 = arith.constant 1.000000e+00 : f32
    %251 = vector.broadcast %cst_96 : f32 to vector<2x128xf32>
    %252 = arith.addf %251, %250 : vector<2x128xf32>
    %253 = arith.divf %251, %252 : vector<2x128xf32>
    %254 = vector.extract_strided_slice %253 {offsets = [0, 0], sizes = [2, 64], strides = [1, 1]} : vector<2x128xf32> to vector<2x64xf32>
    %255 = vector.extract_strided_slice %253 {offsets = [0, 64], sizes = [2, 64], strides = [1, 1]} : vector<2x128xf32> to vector<2x64xf32>
    %c0_97 = arith.constant 0 : index
    %c0_98 = arith.constant 0 : index
    %256 = vector.load %arg6[%c0_97, %c0_98] : memref<1x64xf32, #tpu.memory_space<vmem>>, vector<1x64xf32>
    %257 = vector.extract_strided_slice %247 {offsets = [0, 128], sizes = [2, 64], strides = [1, 1]} : vector<2x192xf32> to vector<2x64xf32>
    %258 = arith.mulf %254, %257 : vector<2x64xf32>
    %259 = vector.broadcast %256 : vector<1x64xf32> to vector<2x64xf32>
    %260 = arith.addf %259, %258 : vector<2x64xf32>
    %261 = math.tanh %260 : vector<2x64xf32>
    %cst_99 = arith.constant 1.000000e+00 : f32
    %262 = vector.broadcast %cst_99 : f32 to vector<2x64xf32>
    %263 = arith.subf %262, %255 : vector<2x64xf32>
    %264 = arith.mulf %263, %261 : vector<2x64xf32>
    %265 = arith.mulf %255, %212 : vector<2x64xf32>
    %266 = arith.addf %264, %265 : vector<2x64xf32>
    %c0_100 = arith.constant 0 : index
    %c0_101 = arith.constant 0 : index
    %267 = vector.load %arg7[%c0_100, %c0_101] : memref<64x192xf32, #tpu.memory_space<vmem>>, vector<64x192xf32>
    %cst_102 = arith.constant dense<0.000000e+00> : vector<2x192xf32>
    %268 = tpu.matmul %266, %267, %cst_102 {dimension_numbers = #tpu.dot_dimension_numbers<[1], [0], [0], [1], [0, 0, 1, 1], [], []>} : vector<2x64xf32>, vector<64x192xf32>, vector<2x192xf32> -> vector<2x192xf32>
    %c0_103 = arith.constant 0 : index
    %c0_104 = arith.constant 0 : index
    %269 = vector.load %arg8[%c0_103, %c0_104] : memref<1x192xf32, #tpu.memory_space<vmem>>, vector<1x192xf32>
    %270 = vector.broadcast %269 : vector<1x192xf32> to vector<2x192xf32>
    %271 = arith.addf %268, %270 : vector<2x192xf32>
    %c0_105 = arith.constant 0 : index
    %c0_106 = arith.constant 0 : index
    %272 = vector.load %arg9[%c0_105, %c0_106] : memref<64x192xf32, #tpu.memory_space<vmem>>, vector<64x192xf32>
    %cst_107 = arith.constant dense<0.000000e+00> : vector<2x192xf32>
    %273 = tpu.matmul %242, %272, %cst_107 {dimension_numbers = #tpu.dot_dimension_numbers<[1], [0], [0], [1], [0, 0, 1, 1], [], []>} : vector<2x64xf32>, vector<64x192xf32>, vector<2x192xf32> -> vector<2x192xf32>
    %274 = vector.extract_strided_slice %271 {offsets = [0, 0], sizes = [2, 128], strides = [1, 1]} : vector<2x192xf32> to vector<2x128xf32>
    %275 = vector.extract_strided_slice %273 {offsets = [0, 0], sizes = [2, 128], strides = [1, 1]} : vector<2x192xf32> to vector<2x128xf32>
    %276 = arith.addf %274, %275 : vector<2x128xf32>
    %277 = arith.negf %276 : vector<2x128xf32>
    %278 = math.exp %277 : vector<2x128xf32>
    %cst_108 = arith.constant 1.000000e+00 : f32
    %279 = vector.broadcast %cst_108 : f32 to vector<2x128xf32>
    %280 = arith.addf %279, %278 : vector<2x128xf32>
    %281 = arith.divf %279, %280 : vector<2x128xf32>
    %282 = vector.extract_strided_slice %281 {offsets = [0, 0], sizes = [2, 64], strides = [1, 1]} : vector<2x128xf32> to vector<2x64xf32>
    %283 = vector.extract_strided_slice %281 {offsets = [0, 64], sizes = [2, 64], strides = [1, 1]} : vector<2x128xf32> to vector<2x64xf32>
    %284 = vector.extract_strided_slice %271 {offsets = [0, 128], sizes = [2, 64], strides = [1, 1]} : vector<2x192xf32> to vector<2x64xf32>
    %285 = vector.extract_strided_slice %273 {offsets = [0, 128], sizes = [2, 64], strides = [1, 1]} : vector<2x192xf32> to vector<2x64xf32>
    %c0_109 = arith.constant 0 : index
    %c0_110 = arith.constant 0 : index
    %286 = vector.load %arg10[%c0_109, %c0_110] : memref<1x64xf32, #tpu.memory_space<vmem>>, vector<1x64xf32>
    %287 = vector.broadcast %286 : vector<1x64xf32> to vector<2x64xf32>
    %288 = arith.addf %285, %287 : vector<2x64xf32>
    %289 = arith.mulf %282, %288 : vector<2x64xf32>
    %290 = arith.addf %284, %289 : vector<2x64xf32>
    %291 = math.tanh %290 : vector<2x64xf32>
    %cst_111 = arith.constant 1.000000e+00 : f32
    %292 = vector.broadcast %cst_111 : f32 to vector<2x64xf32>
    %293 = arith.subf %292, %283 : vector<2x64xf32>
    %294 = arith.mulf %293, %291 : vector<2x64xf32>
    %295 = arith.mulf %283, %242 : vector<2x64xf32>
    %296 = arith.addf %294, %295 : vector<2x64xf32>
    %297 = tpu.concatenate %80, %134, %188, %242, %296 in 1 : vector<2x64xf32>, vector<2x64xf32>, vector<2x64xf32>, vector<2x64xf32>, vector<2x64xf32> -> vector<2x320xf32>
    %c0_112 = arith.constant 0 : index
    %c0_113 = arith.constant 0 : index
    %298 = vector.load %arg11[%c0_112, %c0_113] : memref<320x128xf32, #tpu.memory_space<vmem>>, vector<320x128xf32>
    %cst_114 = arith.constant dense<0.000000e+00> : vector<2x128xf32>
    %299 = tpu.matmul %297, %298, %cst_114 {dimension_numbers = #tpu.dot_dimension_numbers<[1], [0], [0], [1], [0, 0, 1, 1], [], []>} : vector<2x320xf32>, vector<320x128xf32>, vector<2x128xf32> -> vector<2x128xf32>
    %c0_115 = arith.constant 0 : index
    %c0_116 = arith.constant 0 : index
    %300 = vector.load %arg12[%c0_115, %c0_116] : memref<1x128xf32, #tpu.memory_space<vmem>>, vector<1x128xf32>
    %301 = vector.broadcast %300 : vector<1x128xf32> to vector<2x128xf32>
    %302 = arith.addf %299, %301 : vector<2x128xf32>
    %303 = arith.negf %302 : vector<2x128xf32>
    %304 = math.exp %303 : vector<2x128xf32>
    %cst_117 = arith.constant 1.000000e+00 : f32
    %305 = vector.broadcast %cst_117 : f32 to vector<2x128xf32>
    %306 = arith.addf %305, %304 : vector<2x128xf32>
    %307 = arith.divf %305, %306 : vector<2x128xf32>
    %c0_118 = arith.constant 0 : index
    %c0_119 = arith.constant 0 : index
    %308 = vector.load %arg13[%c0_118, %c0_119] : memref<2x128xf32, #tpu.memory_space<vmem>>, vector<2x128xf32>
    tpu.vector_store %arg13[%c0_118, %c0_119], %307 {strides = array<i32>} : memref<2x128xf32, #tpu.memory_space<vmem>>, vector<2x128xf32>,
    return
  }
  func.func @transform_0(%arg0: i32) -> (i32, i32) {
    %c0_i32 = arith.constant 0 : i32
    %c0_i32_0 = arith.constant 0 : i32
    return %arg0, %c0_i32 : i32, i32
  }
  func.func @transform_1(%arg0: i32) -> (i32, i32) {
    %c0_i32 = arith.constant 0 : i32
    %c0_i32_0 = arith.constant 0 : i32
    %c0_i32_1 = arith.constant 0 : i32
    return %c0_i32, %c0_i32_0 : i32, i32
  }
  func.func @transform_2(%arg0: i32) -> (i32, i32) {
    %c0_i32 = arith.constant 0 : i32
    %c0_i32_0 = arith.constant 0 : i32
    %c0_i32_1 = arith.constant 0 : i32
    return %c0_i32, %c0_i32_0 : i32, i32
  }
  func.func @transform_3(%arg0: i32) -> (i32, i32) {
    %c0_i32 = arith.constant 0 : i32
    %c0_i32_0 = arith.constant 0 : i32
    %c0_i32_1 = arith.constant 0 : i32
    return %c0_i32, %c0_i32_0 : i32, i32
  }
  func.func @transform_4(%arg0: i32) -> (i32, i32) {
    %c0_i32 = arith.constant 0 : i32
    %c0_i32_0 = arith.constant 0 : i32
    %c0_i32_1 = arith.constant 0 : i32
    return %c0_i32, %c0_i32_0 : i32, i32
  }
  func.func @transform_5(%arg0: i32) -> (i32, i32) {
    %c0_i32 = arith.constant 0 : i32
    %c0_i32_0 = arith.constant 0 : i32
    %c0_i32_1 = arith.constant 0 : i32
    return %c0_i32, %c0_i32_0 : i32, i32
  }
  func.func @transform_6(%arg0: i32) -> (i32, i32) {
    %c0_i32 = arith.constant 0 : i32
    %c0_i32_0 = arith.constant 0 : i32
    %c0_i32_1 = arith.constant 0 : i32
    return %c0_i32, %c0_i32_0 : i32, i32
  }
  func.func @transform_7(%arg0: i32) -> (i32, i32) {
    %c0_i32 = arith.constant 0 : i32
    %c0_i32_0 = arith.constant 0 : i32
    %c0_i32_1 = arith.constant 0 : i32
    return %c0_i32, %c0_i32_0 : i32, i32
  }
  func.func @transform_8(%arg0: i32) -> (i32, i32) {
    %c0_i32 = arith.constant 0 : i32
    %c0_i32_0 = arith.constant 0 : i32
    %c0_i32_1 = arith.constant 0 : i32
    return %c0_i32, %c0_i32_0 : i32, i32
  }
  func.func @transform_9(%arg0: i32) -> (i32, i32) {
    %c0_i32 = arith.constant 0 : i32
    %c0_i32_0 = arith.constant 0 : i32
    %c0_i32_1 = arith.constant 0 : i32
    return %c0_i32, %c0_i32_0 : i32, i32
  }
  func.func @transform_10(%arg0: i32) -> (i32, i32) {
    %c0_i32 = arith.constant 0 : i32
    %c0_i32_0 = arith.constant 0 : i32
    %c0_i32_1 = arith.constant 0 : i32
    return %c0_i32, %c0_i32_0 : i32, i32
  }
  func.func @transform_11(%arg0: i32) -> (i32, i32) {
    %c0_i32 = arith.constant 0 : i32
    %c0_i32_0 = arith.constant 0 : i32
    %c0_i32_1 = arith.constant 0 : i32
    return %c0_i32, %c0_i32_0 : i32, i32
  }
  func.func @transform_12(%arg0: i32) -> (i32, i32) {
    %c0_i32 = arith.constant 0 : i32
    %c0_i32_0 = arith.constant 0 : i32
    return %arg0, %c0_i32 : i32, i32
  }
}

</mosaic_0001>

<bundles_post_ra>
// kernel: decoder_forward.1
= control target key start
LH: loop header
LB: loop body
LE: loop exit
PB: predicated region body
PF: predicated region fallthrough
CT: control target
= control target key end

     0   :  { %17 = vsyncpa [#allocation3], 0  ;;  %s2935_s0 = inlined_call_operand.hbm [shape: f32[2,4], index: 0, kind: input, shape index: {}]   ;;  %s2936_s1 = inlined_call_operand.hbm [shape: f32[4,64], index: 1, kind: input, shape index: {}]   ;;  %s2937_s2 = inlined_call_operand.vmem [shape: f32[1,64], index: 2, kind: input, shape index: {}]   ;;  %s2938_s3 = inlined_call_operand.hbm [shape: f32[64,192], index: 3, kind: input, shape index: {}]   ;;  %s2939_s4 = inlined_call_operand.vmem [shape: f32[1,192], index: 4, kind: input, shape index: {}]   ;;  %s2940_s5 = inlined_call_operand.vmem [shape: f32[1,64], index: 5, kind: input, shape index: {}]   ;;  %s2941_s6 = inlined_call_operand.hbm [shape: f32[64,192], index: 6, kind: input, shape index: {}]   ;;  %s2942_s7 = inlined_call_operand.vmem [shape: f32[1,192], index: 7, kind: input, shape index: {}]   ;;  %s2943_s8 = inlined_call_operand.hbm [shape: f32[64,192], index: 8, kind: input, shape index: {}]   ;;  %s2944_s9 = inlined_call_operand.vmem [shape: f32[1,64], index: 9, kind: input, shape index: {}]   ;;  %s2945_s10 = inlined_call_operand.hbm [shape: f32[320,128], index: 10, kind: input, shape index: {}]   ;;  %s2946_s11 = inlined_call_operand.vmem [shape: f32[1,128], index: 11, kind: input, shape index: {}]   ;;  %s2947_s12 = inlined_call_operand.hbm [shape: f32[2,128], index: 12, kind: output, shape index: {}]  }
   0x1   :  { %18 = vsyncpa [#allocation6], 0 }
   0x2   :  { %19 = vsyncpa [#allocation9], 0 }
   0x3   :  { %20 = vsyncpa [#allocation12], 0 }
   0x4   :  { %21 = vsyncpa [#allocation4], 0  ;;  %s2411_s21 = smov [#allocation5]   ;;  %s2247_s25 = scalar_lea.hbm %s2936_s1, 64 }
   0x5   :  { %s38_s22 = sshll.u32 %s2411_s21, 4  ;;  %p2248_p0 = scmp.ne.s32.totalorder %s2936_s1, %s2247_s25  ;;  %s39_s22 = int_to_ptr.vmem [resolvable:$true] %s38_s22 }
   0x6   :  { %p2251_p1 = scmp.lt.u32.totalorder %s2247_s25, %s2936_s1 }
   0x8   :  { %p2253_p2 = pnand %p2251_p1, %p2248_p0 }
   0xa   :  { %2256 = shalt.err (!%p2253_p2)
}
   0xb   :  { %s2257_s30 = scalar_lea.vmem %s39_s22, 64  ;;  %p2262_p4 = scmp.lt.s32.totalorder %s39_s22, %s39_s22 }
   0xc   :  { %p2258_p3 = scmp.ne.s32.totalorder %s39_s22, %s2257_s30  ;;  %p2263_p5 = scmp.lt.s32.totalorder %s2257_s30, %s2257_s30 }
   0xe   :  { %p2264_p6 = por %p2263_p5, %p2262_p4 }
  0x10   :  { %p2265_p7 = pnand %p2264_p6, %p2258_p3 }
  0x12   :  { %2268 = shalt.err (!%p2265_p7)
}
  0x13   :  { %41 = dma.hbm_to_vmem [thread:$0]  %s2936_s1, 64, %s39_s22, [#allocation6]  }
  0x14   :  { %s2412_s15 = smov [#allocation8]   ;;  %s2413_s17 = smov [#allocation2]  }
  0x15   :  { %s65_s16 = sshll.u32 %s2412_s15, 4  ;;  %s28_s18 = sshll.u32 %s2413_s17, 4  ;;  %s66_s16 = int_to_ptr.vmem [resolvable:$true] %s65_s16  ;;  %s29_s18 = int_to_ptr.vmem [resolvable:$true] %s28_s18 }
  0x16   :  { %s2269_s21 = scalar_lea.hbm %s2941_s6, 2048 }
  0x17   :  { %p2270_p8 = scmp.ne.s32.totalorder %s2941_s6, %s2269_s21  ;;  %p2273_p9 = scmp.lt.u32.totalorder %s2269_s21, %s2941_s6 }
  0x19   :  { %p2275_p10 = pnand %p2273_p9, %p2270_p8 }
  0x1b   :  { %2278 = shalt.err (!%p2275_p10)
}
  0x1c   :  { %s2279_s1 = scalar_lea.vmem %s66_s16, 2048  ;;  %p2284_p12 = scmp.lt.s32.totalorder %s66_s16, %s66_s16 }
  0x1d   :  { %p2280_p11 = scmp.ne.s32.totalorder %s66_s16, %s2279_s1  ;;  %p2285_p13 = scmp.lt.s32.totalorder %s2279_s1, %s2279_s1 }
  0x1f   :  { %p2286_p0 = por %p2285_p13, %p2284_p12 }
  0x21   :  { %p2287_p1 = pnand %p2286_p0, %p2280_p11 }
  0x23   :  { %2290 = shalt.err (!%p2287_p1)
}
  0x24   :  { %s2414_s22 = smov 256   ;;  %s2415_s27 = smov 16  }
  0x25   :  { %71 = dma.hbm_to_vmem [thread:$0]  %s2941_s6, 2048, %s66_s16, [#allocation9], %s2414_s22, %s2414_s22, %s2415_s27  }
  0x26   :  { %s2291_s14 = scalar_lea.hbm %s2935_s0, 32 }
  0x27   :  { %p2292_p2 = scmp.ne.s32.totalorder %s2935_s0, %s2291_s14  ;;  %p2295_p3 = scmp.lt.u32.totalorder %s2291_s14, %s2935_s0 }
  0x29   :  { %p2297_p4 = pnand %p2295_p3, %p2292_p2 }
  0x2b   :  { %2300 = shalt.err (!%p2297_p4)
}
  0x2c   :  { %s2301_s21 = scalar_lea.vmem %s29_s18, 32  ;;  %p2306_p6 = scmp.lt.s32.totalorder %s29_s18, %s29_s18 }
  0x2d   :  { %p2302_p5 = scmp.ne.s32.totalorder %s29_s18, %s2301_s21  ;;  %p2307_p7 = scmp.lt.s32.totalorder %s2301_s21, %s2301_s21 }
  0x2f   :  { %p2308_p8 = por %p2307_p7, %p2306_p6 }
  0x31   :  { %p2309_p9 = pnand %p2308_p8, %p2302_p5 }
  0x33   :  { %2312 = shalt.err (!%p2309_p9)
}
  0x34   :  { %31 = dma.hbm_to_vmem [thread:$0]  %s2935_s0, 32, %s29_s18, [#allocation3]  }
  0x35   :  { %s2416_s23 = smov [#allocation7]   ;;  %s2417_s25 = smov [#allocation10]  }
  0x36   :  { %s49_s24 = sshll.u32 %s2416_s23, 4  ;;  %s79_s26 = sshll.u32 %s2417_s25, 4  ;;  %s50_s24 = int_to_ptr.vmem [resolvable:$true] %s49_s24  ;;  %s80_s26 = int_to_ptr.vmem [resolvable:$true] %s79_s26 }
  0x37   :  { %s2313_s29 = scalar_lea.hbm %s2938_s3, 2048 }
  0x38   :  { %p2314_p10 = scmp.ne.s32.totalorder %s2938_s3, %s2313_s29  ;;  %p2317_p11 = scmp.lt.u32.totalorder %s2313_s29, %s2938_s3 }
  0x3a   :  { %p2319_p12 = pnand %p2317_p11, %p2314_p10 }
  0x3c   :  { %2322 = shalt.err (!%p2319_p12)
}
  0x3d   :  { %s2323_s0 = scalar_lea.vmem %s50_s24, 2048  ;;  %p2328_p0 = scmp.lt.s32.totalorder %s50_s24, %s50_s24 }
  0x3e   :  { %p2324_p13 = scmp.ne.s32.totalorder %s50_s24, %s2323_s0  ;;  %p2329_p1 = scmp.lt.s32.totalorder %s2323_s0, %s2323_s0 }
  0x40   :  { %p2330_p2 = por %p2329_p1, %p2328_p0 }
  0x42   :  { %p2331_p3 = pnand %p2330_p2, %p2324_p13 }
  0x44   :  { %2334 = shalt.err (!%p2331_p3)
}
  0x45   :  { %55 = dma.hbm_to_vmem [thread:$0]  %s2938_s3, 2048, %s50_s24, [#allocation6], %s2414_s22, %s2414_s22, %s2415_s27  }
  0x46   :  { %s2335_s21 = scalar_lea.hbm %s2943_s8, 2048 }
  0x47   :  { %p2336_p4 = scmp.ne.s32.totalorder %s2943_s8, %s2335_s21  ;;  %p2339_p5 = scmp.lt.u32.totalorder %s2335_s21, %s2943_s8 }
  0x49   :  { %p2341_p6 = pnand %p2339_p5, %p2336_p4 }
  0x4b   :  { %2344 = shalt.err (!%p2341_p6)
}
  0x4c   :  { %s2345_s1 = scalar_lea.vmem %s80_s26, 2048  ;;  %p2350_p8 = scmp.lt.s32.totalorder %s80_s26, %s80_s26 }
  0x4d   :  { %p2346_p7 = scmp.ne.s32.totalorder %s80_s26, %s2345_s1  ;;  %p2351_p9 = scmp.lt.s32.totalorder %s2345_s1, %s2345_s1 }
  0x4f   :  { %p2352_p10 = por %p2351_p9, %p2350_p8 }
  0x51   :  { %p2353_p11 = pnand %p2352_p10, %p2346_p7 }
  0x53   :  { %2356 = shalt.err (!%p2353_p11)
}
  0x54   :  { %85 = dma.hbm_to_vmem [thread:$0]  %s2943_s8, 2048, %s80_s26, [#allocation9], %s2414_s22, %s2414_s22, %s2415_s27  }
  0x55   :  { %s2418_s28 = smov [#allocation11]   ;;  %s2357_s14 = scalar_lea.hbm %s2945_s10, 5120 }
  0x56   :  { %s93_s29 = sshll.u32 %s2418_s28, 4  ;;  %p2358_p12 = scmp.ne.s32.totalorder %s2945_s10, %s2357_s14  ;;  %s94_s29 = int_to_ptr.vmem [resolvable:$true] %s93_s29 }
  0x57   :  { %p2361_p13 = scmp.lt.u32.totalorder %s2357_s14, %s2945_s10 }
  0x59   :  { %p2363_p0 = pnand %p2361_p13, %p2358_p12 }
  0x5b   :  { %2366 = shalt.err (!%p2363_p0)
}
  0x5c   :  { %s2367_s19 = scalar_lea.vmem %s94_s29, 5120  ;;  %p2372_p2 = scmp.lt.s32.totalorder %s94_s29, %s94_s29 }
  0x5d   :  { %p2368_p1 = scmp.ne.s32.totalorder %s94_s29, %s2367_s19  ;;  %p2373_p3 = scmp.lt.s32.totalorder %s2367_s19, %s2367_s19 }
  0x5f   :  { %p2374_p4 = por %p2373_p3, %p2372_p2 }
  0x61   :  { %p2375_p5 = pnand %p2374_p4, %p2368_p1 }
  0x63   :  { %2378 = shalt.err (!%p2375_p5)
}
  0x64   :  { %s2419_s8 = smov 128   ;;  %s2420_s22 = smov 8  }
  0x65   :  { %99 = dma.hbm_to_vmem [thread:$0]  %s2945_s10, 5120, %s94_s29, [#allocation12], %s2419_s8, %s2419_s8, %s2420_s22  }
  0x66   :  { %2401 = dma.done.wait [#allocation3], 32  }
  0x67   :  { %2402 = vsyncadd [#allocation3], 4294967264 }
  0x68   :  { %2403 = dma.done.wait [#allocation6], 2112  }
  0x69   :  { %2404 = vsyncadd [#allocation6], 4294965184 }
  0x6a   :  { %2405 = dma.done.wait [#allocation9], 4096  }
  0x6b   :  { %2406 = vsyncadd [#allocation9], 4294963200 }
  0x6c   :  { %2407 = dma.done.wait [#allocation12], 5120  }
  0x6d   :  { %2408 = vsyncadd [#allocation12], 4294962176  ;;  %v2421_v0 = vmov 0   ;;  %v2422_v1 = vmov 2   ;;  %v120_v2 = vld [vmem:[#allocation2] sm:$0x3] }
  0x6e   :  { %2178 = vset.pattern.permute.xlu0 %v2421_v0  ;;  %2180 = vset.pattern.permute.xlu1 %v2422_v1  ;;  %v174_v3 = vld [vmem:[#allocation7 + $0x8] sm:$0xff]  ;;  %v176_v4 = vld [vmem:[#allocation7 + $0x18] sm:$0xff]  ;;  %v173_v6 = vld [vmem:[#allocation7] sm:$0xff]  ;;  %v2423_v17 = vmov 1   ;;  %v2424_v18 = vmov 3   ;;  %v2425_v31 = vmov 0.0  }
  0x6f   :  { %125 = vperm.xlu0 %2178, %v120_v2   ;;  %153 = vperm.xlu1 %2180, %v120_v2   ;;  %v2576_v5 = vpack.c.bf16 %v176_v4, %v174_v3  ;;  %v175_v7 = vld [vmem:[#allocation7 + $0x10] sm:$0xff]  ;;  %v178_v9 = vld [vmem:[#allocation7 + $0x28] sm:$0xff]  ;;  %v180_v10 = vld [vmem:[#allocation7 + $0x38] sm:$0xff]  ;;  %vm201_vm0 = vcmask 523264   ;;  %vm2428_vm1 = vmmov 0   ;;  %s2429_s3 = smov [#allocation13]  }
  0x70   :  { %v2578_v8 = vpack.c.bf16 %v175_v7, %v173_v6  ;;  %v2581_v11 = vpack.c.bf16 %v180_v10, %v178_v9  ;;  %v177_v12 = vld [vmem:[#allocation7 + $0x20] sm:$0xff]  ;;  %v179_v13 = vld [vmem:[#allocation7 + $0x30] sm:$0xff]  ;;  %v182_v15 = vld [vmem:[#allocation7 + $0x48] sm:$0xff]  ;;  %269 = vmatprep.mubr.f32.mxu0 %v2425_v31  ;;  %400 = vmatprep.mubr.f32.mxu1 %v2425_v31  ;;  %v191_v9 = vlaneseq  ;;  %s1765_s24 = sshll.u32 %s2429_s3, 4  ;;  %s1766_s24 = int_to_ptr.vmem [resolvable:$true] %s1765_s24 }
  0x71   :  { %1876 = vmatprep.subr.bf16.mxu0 %v2576_v5  ;;  %v2584_v14 = vpack.c.bf16 %v179_v13, %v177_v12  ;;  %v184_v16 = vld [vmem:[#allocation7 + $0x58] sm:$0xff]  ;;  %v181_v20 = vld [vmem:[#allocation7 + $0x40] sm:$0xff]  ;;  %v183_v21 = vld [vmem:[#allocation7 + $0x50] sm:$0xff]  ;;  %s2379_s28 = scalar_lea.vmem %s1766_s24, 32  ;;  %p2384_p7 = scmp.lt.s32.totalorder %s1766_s24, %s1766_s24 }
  0x72   :  { %1878 = vmatpush1.bf16.msra.mxu0 %v2578_v8  ;;  %v2586_v19 = vpack.c.bf16 %v184_v16, %v182_v15  ;;  %v186_v22 = vld [vmem:[#allocation7 + $0x68] sm:$0xff]  ;;  %v188_v23 = vld [vmem:[#allocation7 + $0x78] sm:$0xff]  ;;  %v2590_v24 = vpack.c.bf16 %v183_v21, %v181_v20  ;;  %v185_v26 = vld [vmem:[#allocation7 + $0x60] sm:$0xff]  ;;  %v2634_v10 = vshrl.u32 %v191_v9, 7  ;;  %p2380_p6 = scmp.ne.s32.totalorder %s1766_s24, %s2379_s28  ;;  %p2385_p8 = scmp.lt.s32.totalorder %s2379_s28, %s2379_s28 }
  0x73   :  { %2179 = vset.pattern.permute.xlu0 %v2423_v17  ;;  %2181 = vset.pattern.permute.xlu1 %v2424_v18  ;;  %v2593_v25 = vpack.c.bf16 %v188_v23, %v186_v22  ;;  %v187_v27 = vld [vmem:[#allocation7 + $0x70] sm:$0xff]  ;;  %v408_v28 = vld [vmem:[#allocation10 + $0x8] sm:$0xff]  ;;  %v410_v29 = vld [vmem:[#allocation10 + $0x18] sm:$0xff] }
  0x74   :  { %142 = vperm.xlu0 %2179, %v120_v2   ;;  %164 = vperm.xlu1 %2181, %v120_v2   ;;  %v2596_v30 = vpack.c.bf16 %v187_v27, %v185_v26  ;;  %v2600_v32 = vpack.c.bf16 %v410_v29, %v408_v28  ;;  %v1777_v33 = vld [vmem:[#allocation5] ss:$0 sm:$0xff]  ;;  %v1778_v37 = vld [vmem:[%s2937_s2] ss:$0 sm:$0xff]  ;;  %v1779_v38 = vld [vmem:[#allocation5 + $0x1] ss:$0 sm:$0xff]  ;;  %p2386_p9 = por %p2385_p8, %p2384_p7 }
  0x75   :  { %1880 = vmatprep.subr.bf16.mxu0 %v2581_v11  ;;  %v1780_v39 = vld [vmem:[#allocation5 + $0x2] ss:$0 sm:$0xff]  ;;  %v1781_v41 = vld [vmem:[#allocation5 + $0x3] ss:$0 sm:$0xff]  ;;  %v407_v48 = vld [vmem:[#allocation10] sm:$0xff]  ;;  %s2426_s2 = smov 64  }
  0x76   :  { %1882 = vmatpush1.bf16.msra.mxu0 %v2584_v14  ;;  %v409_v49 = vld [vmem:[#allocation10 + $0x10] sm:$0xff]  ;;  %v412_v50 = vld [vmem:[#allocation10 + $0x28] sm:$0xff]  ;;  %v414_v51 = vld [vmem:[#allocation10 + $0x38] sm:$0xff]  ;;  %v193_v12 = vsub.s32 0, %v2634_v10  ;;  %v197_v27 = vsub.s32 1, %v2634_v10  ;;  %p2387_p10 = pnand %p2386_p9, %p2380_p6 }
  0x77   :  { %1884 = vmatprep.subr.bf16.mxu0 %v2586_v19  ;;  %v2608_v53 = vpack.c.bf16 %v409_v49, %v407_v48  ;;  %v2610_v55 = vpack.c.bf16 %v414_v51, %v412_v50  ;;  %v411_v56 = vld [vmem:[#allocation10 + $0x20] sm:$0xff]  ;;  %v413_v57 = vld [vmem:[#allocation10 + $0x30] sm:$0xff]  ;;  %v416_v58 = vld [vmem:[#allocation10 + $0x48] sm:$0xff] }
  0x78   :  { %2182 = vset.pattern.permute.xlu0 %v2424_v18  ;;  %v418_v59 = vld [vmem:[#allocation10 + $0x58] sm:$0xff]  ;;  %v2615_v60 = vpack.c.bf16 %v413_v57, %v411_v56  ;;  %v415_v62 = vld [vmem:[#allocation10 + $0x40] sm:$0xff]  ;;  %v417_v63 = vld [vmem:[#allocation10 + $0x50] sm:$0xff] }
  0x79   :  { %v2619_v61 = vpack.c.bf16 %v418_v59, %v416_v58  ;;  %v420_v0 = vld [vmem:[#allocation10 + $0x68] sm:$0xff]  ;;  %v422_v1 = vld [vmem:[#allocation10 + $0x78] sm:$0xff]  ;;  %v2622_v2 = vpack.c.bf16 %v417_v63, %v415_v62  ;;  %v419_v4 = vld [vmem:[#allocation10 + $0x60] sm:$0xff] }
  0x7a   :  { %1886 = vmatpush1.bf16.msra.mxu0 %v2590_v24  ;;  %v2625_v3 = vpack.c.bf16 %v422_v1, %v420_v0  ;;  %v421_v6 = vld [vmem:[#allocation10 + $0x70] sm:$0xff]  ;;  %v189_v13 = vld [vmem:[%s2939_s4] sm:$0x3]  ;;  %v312_v48 = vld [vmem:[#allocation8 + $0x48] sm:$0xff] }
  0x7b   :  { %1888 = vmatprep.subr.bf16.mxu0 %v2593_v25  ;;  %v2628_v7 = vpack.c.bf16 %v421_v6, %v419_v4  ;;  %v2642_v15 = vrot.slane %v189_v13, %v193_v12  ;;  %v2652_v28 = vrot.slane %v189_v13, %v197_v27  ;;  %v314_v49 = vld [vmem:[#allocation8 + $0x58] sm:$0xff]  ;;  %v316_v56 = vld [vmem:[#allocation8 + $0x68] sm:$0xff]  ;;  %v315_v63 = vld [vmem:[#allocation8 + $0x60] sm:$0xff] }
  0x7c   :  { %v2674_v51 = vpack.c.bf16 %v314_v49, %v312_v48  ;;  %v318_v57 = vld [vmem:[#allocation8 + $0x78] sm:$0xff]  ;;  %v317_v0 = vld [vmem:[#allocation8 + $0x70] sm:$0xff] }
  0x7d   :  { %v2683_v62 = vpack.c.bf16 %v318_v57, %v316_v56  ;;  %v2687_v1 = vpack.c.bf16 %v317_v0, %v315_v63 }
  0x7e   :  { %1890 = vmatpush1.bf16.msra.mxu0 %v2596_v30 }
  0x7f   :  { %1908 = vmatprep.subr.bf16.mxu0 %v2600_v32 }
  0xee   :  { %v126_v34 = vpop.permute.xlu0 %125  ;;  %v154_v35 = vpop.permute.xlu1 %153 }
  0xef   :  { %v132_v36 = vmul.f32 %v1777_v33, %v126_v34  ;;  %v160_v45 = vmul.f32 %v1780_v39, %v154_v35  ;;  %v2658_v34 = vld [vmem:[%s2940_s5] ss:$0 sm:$0xff]  ;;  %v303_v39 = vld [vmem:[#allocation8] sm:$0xff] }
  0xf1   :  { %v139_v43 = vadd.f32 %v1778_v37, %v132_v36  ;;  %v304_v37 = vld [vmem:[#allocation8 + $0x8] sm:$0xff] }
  0xf3   :  { %v143_v40 = vpop.permute.xlu0 %142  ;;  %v165_v42 = vpop.permute.xlu1 %164 }
  0xf4   :  { %v149_v44 = vmul.f32 %v1779_v38, %v143_v40  ;;  %v171_v47 = vmul.f32 %v1781_v41, %v165_v42  ;;  %v306_v38 = vld [vmem:[#allocation8 + $0x18] sm:$0xff]  ;;  %v305_v41 = vld [vmem:[#allocation8 + $0x10] sm:$0xff]  ;;  %v308_v42 = vld [vmem:[#allocation8 + $0x28] sm:$0xff] }
  0xf5   :  { %v2661_v40 = vpack.c.bf16 %v306_v38, %v304_v37 }
  0xf6   :  { %v150_v46 = vadd.f32 %v149_v44, %v139_v43  ;;  %v310_v43 = vld [vmem:[#allocation8 + $0x38] sm:$0xff]  ;;  %v2663_v44 = vpack.c.bf16 %v305_v41, %v303_v39 }
  0xf7   :  { %1892 = vmatprep.subr.bf16.mxu1 %v2661_v40 }
  0xf8   :  { %v161_v52 = vadd.f32 %v160_v45, %v150_v46  ;;  %v2665_v45 = vpack.c.bf16 %v310_v43, %v308_v42  ;;  %v307_v46 = vld [vmem:[#allocation8 + $0x20] sm:$0xff]  ;;  %1894 = vmatpush1.bf16.msra.mxu1 %v2663_v44 }
  0xfa   :  { %v172_v54 = vadd.f32 %v171_v47, %v161_v52  ;;  %v309_v47 = vld [vmem:[#allocation8 + $0x30] sm:$0xff]  ;;  %1896 = vmatprep.subr.bf16.mxu1 %v2665_v45  ;;  %v311_v52 = vld [vmem:[#allocation8 + $0x40] sm:$0xff] }
  0xfb   :  { %v2670_v50 = vpack.c.bf16 %v309_v47, %v307_v46 }
  0xfc   :  { %298 = vrot.lane.b32.xlu0 %v172_v54, %s2426_s2  ;;  %1782 = vmatmul.mubr.msk.f32.vlgmr.msra.gmra.mrb[0].mxu0 %vm201_vm0, %v172_v54 }
  0xfd   :  { %1910 = vmatpush1.bf16.msra.mxu0 %v2608_v53  ;;  %487 = vmatprep.mubr.f32.mxu0 %v2425_v31 }
  0xfe   :  { %1912 = vmatprep.subr.bf16.mxu0 %v2610_v55  ;;  %1898 = vmatpush1.bf16.msra.mxu1 %v2670_v50 }
  0xff   :  { %1900 = vmatprep.subr.bf16.mxu1 %v2674_v51 }
 0x101   :  { %1914 = vmatpush1.bf16.msra.mxu0 %v2615_v60 }
 0x102   :  { %1916 = vmatprep.subr.bf16.mxu0 %v2619_v61 }
 0x105   :  { %1918 = vmatpush1.bf16.msra.mxu0 %v2622_v2 }
 0x106   :  { %1920 = vmatprep.subr.bf16.mxu0 %v2625_v3 }
 0x109   :  { %1922 = vmatpush1.bf16.msra.mxu0 %v2628_v7 }
 0x10a   :  { %1940 = vmatprep.subr.bf16.mxu0 %v2661_v40 }
 0x10c   :  { %1786 = vmatmul.mubr.msk.f32.vlgmr.msra.gmra.mrb[2].mxu0 %vm201_vm0, %v172_v54  ;;  %v313_v54 = vld [vmem:[#allocation8 + $0x50] sm:$0xff] }
 0x10d   :  { %677 = vmatprep.mubr.f32.mxu0 %v2425_v31  ;;  %1942 = vmatpush1.bf16.msra.mxu0 %v2663_v44  ;;  %v2678_v59 = vpack.c.bf16 %v313_v54, %v311_v52 }
 0x10e   :  { %1944 = vmatprep.subr.bf16.mxu0 %v2665_v45 }
 0x10f   :  { %1902 = vmatpush1.bf16.msra.mxu1 %v2678_v59 }
 0x110   :  { %1904 = vmatprep.subr.bf16.mxu1 %v2683_v62 }
 0x111   :  { %1946 = vmatpush1.bf16.msra.mxu0 %v2670_v50 }
 0x112   :  { %1948 = vmatprep.subr.bf16.mxu0 %v2674_v51 }
 0x113   :  { %1906 = vmatpush1.bf16.msra.mxu1 %v2687_v1 }
 0x114   :  { %1924 = vmatprep.subr.bf16.mxu1 %v2576_v5 }
 0x115   :  { %1950 = vmatpush1.bf16.msra.mxu0 %v2678_v59 }
 0x116   :  { %1952 = vmatprep.subr.bf16.mxu0 %v2683_v62 }
 0x119   :  { %1954 = vmatpush1.bf16.msra.mxu0 %v2687_v1 }
 0x11a   :  { %1972 = vmatprep.subr.bf16.mxu0 %v2576_v5 }
 0x16e   :  { %v2696_v6 = vpop.permute.xlu0 %298 }
 0x1cf   :  { %v271_v16 = vpop.f32.mrb[0].mxu0 }
 0x1d0   :  { %v272_v17 = vadd.f32 %v271_v16, %v2642_v15  ;;  %v273_v18 = vpop.f32.mrb[1].mxu0 }
 0x1d1   :  { %v274_v29 = vadd.f32 %v273_v18, %v2652_v28 }
 0x1d2   :  { %v1783_v20 = vmul.f32 -1.442695, %v272_v17 }
 0x1d4   :  { %2183 = vpow2.f32 %v1783_v20  ;;  %v319_v20 = vld [vmem:[%s2942_s7] sm:$0x3] }
 0x1d5   :  { %v2740_v46 = vrot.slane %v319_v20, %v197_v27 }
 0x1de   :  { %v2184_v21 = vpop.eup %2183 }
 0x1df   :  { %v279_v22 = vadd.f32 1.0, %v2184_v21  ;;  %v2645_v23 = vpop.f32.mrb[2].mxu0  ;;  %v2728_v21 = vrot.slane %v319_v20, %v193_v12  ;;  %v2736_v12 = vld [vmem:[%s2944_s9] ss:$0 sm:$0xff] }
 0x1e0   :  { %v2647_v26 = vpop.f32.mrb[3].mxu0 }
 0x1e1   :  { %2185 = vrcp.f32 %v279_v22 }
 0x1eb   :  { %v2186_v33 = vpop.eup %2185 }
 0x1ec   :  { %v283_v35 = vmul.f32 %v2186_v33, %v274_v29  ;;  %v292_v4 = vsub.f32 1.0, %v2186_v33  ;;  %v301_v13 = vmul.f32 %v2186_v33, %v2696_v6 }
 0x1ee   :  { %v290_v36 = vadd.f32 %v2658_v34, %v283_v35 }
 0x1f0   :  { %2187 = vtanh.f32 %v290_v36 }
 0x1fa   :  { %v2188_v58 = vpop.eup %2187 }
 0x1fb   :  { %294 = vrot.lane.b32.xlu1 %v2188_v58, %s2426_s2 }
 0x26d   :  { %v295_v9 = vpop.permute.xlu1 %294 }
 0x26e   :  { %v297_v16 = vmul.f32 %v295_v9, %v292_v4 }
 0x270   :  { %v2699_v17 = vadd.f32 %v301_v13, %v297_v16 }
 0x272   :  { %332 = vrot.lane.b32.xlu1 %v2699_v17, %s2426_s2 }
 0x2e4   :  { %v333_v18 = vpop.permute.xlu1 %332 }
 0x2e5   :  { %1785 = vmatmul.mubr.msk.f32.vlgmr.msra.gmra.mrb[0].mxu1 %vm201_vm0, %v333_v18 }
 0x2e6   :  { %1926 = vmatpush1.bf16.msra.mxu1 %v2578_v8  ;;  %584 = vmatprep.mubr.f32.mxu1 %v2425_v31 }
 0x2e7   :  { %1928 = vmatprep.subr.bf16.mxu1 %v2581_v11 }
 0x2ea   :  { %1930 = vmatpush1.bf16.msra.mxu1 %v2584_v14 }
 0x2eb   :  { %1932 = vmatprep.subr.bf16.mxu1 %v2586_v19 }
 0x2ee   :  { %1934 = vmatpush1.bf16.msra.mxu1 %v2590_v24 }
 0x2ef   :  { %1936 = vmatprep.subr.bf16.mxu1 %v2593_v25 }
 0x2f2   :  { %1938 = vmatpush1.bf16.msra.mxu1 %v2596_v30 }
 0x2f3   :  { %1956 = vmatprep.subr.bf16.mxu1 %v2600_v32 }
 0x2f5   :  { %1789 = vmatmul.mubr.msk.f32.vlgmr.msra.gmra.mrb[2].mxu1 %vm201_vm0, %v333_v18 }
 0x2f6   :  { %1958 = vmatpush1.bf16.msra.mxu1 %v2608_v53  ;;  %753 = vmatprep.mubr.f32.mxu1 %v2425_v31 }
 0x2f7   :  { %1960 = vmatprep.subr.bf16.mxu1 %v2610_v55 }
 0x2fa   :  { %1962 = vmatpush1.bf16.msra.mxu1 %v2615_v60 }
 0x2fb   :  { %1964 = vmatprep.subr.bf16.mxu1 %v2619_v61 }
 0x2fe   :  { %1966 = vmatpush1.bf16.msra.mxu1 %v2622_v2 }
 0x2ff   :  { %1968 = vmatprep.subr.bf16.mxu1 %v2625_v3 }
 0x302   :  { %1970 = vmatpush1.bf16.msra.mxu1 %v2628_v7 }
 0x303   :  { %1988 = vmatprep.subr.bf16.mxu1 %v2661_v40 }
 0x3b8   :  { %v402_v22 = vpop.f32.mrb[0].mxu1 }
 0x3b9   :  { %v403_v29 = vadd.f32 %v402_v22, %v2728_v21  ;;  %v404_v33 = vpop.f32.mrb[1].mxu1 }
 0x3ba   :  { %v405_v49 = vadd.f32 %v404_v33, %v2740_v46 }
 0x3bb   :  { %v494_v35 = vadd.f32 %v2645_v23, %v403_v29  ;;  %v508_v23 = vadd.f32 %v2736_v12, %v2647_v26 }
 0x3bd   :  { %v1787_v36 = vmul.f32 -1.442695, %v494_v35 }
 0x3bf   :  { %2189 = vpow2.f32 %v1787_v36 }
 0x3c8   :  { %v586_v37 = vpop.f32.mrb[2].mxu1 }
 0x3c9   :  { %v2190_v38 = vpop.eup %2189  ;;  %v587_v39 = vadd.f32 %v586_v37, %v2642_v15  ;;  %v588_v41 = vpop.f32.mrb[3].mxu1 }
 0x3ca   :  { %v498_v42 = vadd.f32 1.0, %v2190_v38  ;;  %v589_v57 = vadd.f32 %v588_v41, %v2652_v28 }
 0x3cb   :  { %v1790_v43 = vmul.f32 -1.442695, %v587_v39 }
 0x3cc   :  { %2191 = vrcp.f32 %v498_v42 }
 0x3cd   :  { %2193 = vpow2.f32 %v1790_v43 }
 0x3d6   :  { %v2192_v47 = vpop.eup %2191 }
 0x3d7   :  { %v2194_v48 = vpop.eup %2193  ;;  %v509_v52 = vmul.f32 %v2192_v47, %v508_v23  ;;  %v512_v27 = vsub.f32 1.0, %v2192_v47  ;;  %v518_v9 = vmul.f32 %v2192_v47, %v2696_v6 }
 0x3d8   :  { %v594_v54 = vadd.f32 1.0, %v2194_v48 }
 0x3d9   :  { %v510_v56 = vadd.f32 %v509_v52, %v405_v49 }
 0x3da   :  { %2195 = vrcp.f32 %v594_v54 }
 0x3db   :  { %2197 = vtanh.f32 %v510_v56 }
 0x3e4   :  { %v2196_v58 = vpop.eup %2195 }
 0x3e5   :  { %v2198_v63 = vpop.eup %2197  ;;  %v597_v0 = vmul.f32 %v2196_v58, %v589_v57  ;;  %v600_v18 = vsub.f32 1.0, %v2196_v58  ;;  %v606_v22 = vmul.f32 %v2196_v58, %v2699_v17 }
 0x3e6   :  { %514 = vrot.lane.b32.xlu1 %v2198_v63, %s2426_s2 }
 0x3e7   :  { %v598_v10 = vadd.f32 %v2658_v34, %v597_v0 }
 0x3e9   :  { %2199 = vtanh.f32 %v598_v10 }
 0x3f3   :  { %v2200_v26 = vpop.eup %2199 }
 0x3f4   :  { %602 = vrot.lane.b32.xlu0 %v2200_v26, %s2426_s2 }
 0x458   :  { %v515_v4 = vpop.permute.xlu1 %514 }
 0x459   :  { %v517_v13 = vmul.f32 %v515_v4, %v512_v27 }
 0x45b   :  { %v2750_v16 = vadd.f32 %v518_v9, %v517_v13 }
 0x45d   :  { %685 = vrot.lane.b32.xlu1 %v2750_v16, %s2426_s2 }
 0x466   :  { %v603_v20 = vpop.permute.xlu0 %602 }
 0x467   :  { %v605_v29 = vmul.f32 %v603_v20, %v600_v18 }
 0x469   :  { %v2755_v33 = vadd.f32 %v606_v22, %v605_v29 }
 0x46b   :  { %609 = vrot.lane.b32.xlu0 %v2755_v33, %s2426_s2 }
 0x4cf   :  { %v2759_v35 = vpop.permute.xlu1 %685 }
 0x4d0   :  { %1792 = vmatmul.mubr.msk.f32.vlgmr.msra.gmra.mrb[4].mxu1 %vm201_vm0, %v2759_v35 }
 0x4d1   :  { %1990 = vmatpush1.bf16.msra.mxu1 %v2663_v44  ;;  %936 = vmatprep.mubr.f32.mxu1 %v2425_v31 }
 0x4d2   :  { %1992 = vmatprep.subr.bf16.mxu1 %v2665_v45 }
 0x4d5   :  { %1994 = vmatpush1.bf16.msra.mxu1 %v2670_v50 }
 0x4d6   :  { %1996 = vmatprep.subr.bf16.mxu1 %v2674_v51 }
 0x4d9   :  { %1998 = vmatpush1.bf16.msra.mxu1 %v2678_v59 }
 0x4da   :  { %2000 = vmatprep.subr.bf16.mxu1 %v2683_v62 }
 0x4dd   :  { %v610_v6 = vpop.permute.xlu0 %609  ;;  %2002 = vmatpush1.bf16.msra.mxu1 %v2687_v1 }
 0x4de   :  { %1791 = vmatmul.mubr.msk.f32.vlgmr.msra.gmra.mrb[4].mxu0 %vm201_vm0, %v610_v6  ;;  %2020 = vmatprep.subr.bf16.mxu1 %v2576_v5 }
 0x4df   :  { %1974 = vmatpush1.bf16.msra.mxu0 %v2578_v8  ;;  %843 = vmatprep.mubr.f32.mxu0 %v2425_v31 }
 0x4e0   :  { %1976 = vmatprep.subr.bf16.mxu0 %v2581_v11 }
 0x4e3   :  { %1978 = vmatpush1.bf16.msra.mxu0 %v2584_v14 }
 0x4e4   :  { %1980 = vmatprep.subr.bf16.mxu0 %v2586_v19 }
 0x4e7   :  { %1982 = vmatpush1.bf16.msra.mxu0 %v2590_v24 }
 0x4e8   :  { %1984 = vmatprep.subr.bf16.mxu0 %v2593_v25 }
 0x4eb   :  { %1986 = vmatpush1.bf16.msra.mxu0 %v2596_v30 }
 0x4ec   :  { %2004 = vmatprep.subr.bf16.mxu0 %v2600_v32 }
 0x4ee   :  { %1794 = vmatmul.mubr.msk.f32.vlgmr.msra.gmra.mrb[6].mxu0 %vm201_vm0, %v610_v6 }
 0x4ef   :  { %2006 = vmatpush1.bf16.msra.mxu0 %v2608_v53  ;;  %1012 = vmatprep.mubr.f32.mxu0 %v2425_v31 }
 0x4f0   :  { %2008 = vmatprep.subr.bf16.mxu0 %v2610_v55 }
 0x4f3   :  { %2010 = vmatpush1.bf16.msra.mxu0 %v2615_v60 }
 0x4f4   :  { %2012 = vmatprep.subr.bf16.mxu0 %v2619_v61 }
 0x4f7   :  { %2014 = vmatpush1.bf16.msra.mxu0 %v2622_v2 }
 0x4f8   :  { %2016 = vmatprep.subr.bf16.mxu0 %v2625_v3 }
 0x4fb   :  { %2018 = vmatpush1.bf16.msra.mxu0 %v2628_v7 }
 0x4fc   :  { %2036 = vmatprep.subr.bf16.mxu0 %v2661_v40 }
 0x5a3   :  { %v755_v17 = vpop.f32.mrb[4].mxu1 }
 0x5a4   :  { %v757_v36 = vpop.f32.mrb[5].mxu1 }
 0x5a5   :  { %v767_v54 = vadd.f32 %v2736_v12, %v757_v36 }
 0x5b1   :  { %v679_v37 = vpop.f32.mrb[4].mxu0 }
 0x5b2   :  { %v680_v38 = vadd.f32 %v679_v37, %v2728_v21  ;;  %v681_v39 = vpop.f32.mrb[5].mxu0 }
 0x5b3   :  { %v682_v58 = vadd.f32 %v681_v39, %v2740_v46 }
 0x5b4   :  { %v760_v41 = vadd.f32 %v755_v17, %v680_v38 }
 0x5b6   :  { %v1793_v42 = vmul.f32 -1.442695, %v760_v41 }
 0x5b8   :  { %2201 = vpow2.f32 %v1793_v42 }
 0x5c1   :  { %v845_v43 = vpop.f32.mrb[6].mxu0 }
 0x5c2   :  { %v2202_v23 = vpop.eup %2201  ;;  %v846_v47 = vadd.f32 %v845_v43, %v2642_v15  ;;  %v847_v48 = vpop.f32.mrb[7].mxu0 }
 0x5c3   :  { %v764_v49 = vadd.f32 1.0, %v2202_v23  ;;  %v848_v26 = vadd.f32 %v847_v48, %v2652_v28 }
 0x5c4   :  { %v1795_v52 = vmul.f32 -1.442695, %v846_v47 }
 0x5c5   :  { %2203 = vrcp.f32 %v764_v49 }
 0x5c6   :  { %2205 = vpow2.f32 %v1795_v52 }
 0x5cf   :  { %v2204_v56 = vpop.eup %2203 }
 0x5d0   :  { %v2206_v57 = vpop.eup %2205  ;;  %v768_v63 = vmul.f32 %v2204_v56, %v767_v54  ;;  %v771_v20 = vsub.f32 1.0, %v2204_v56  ;;  %v777_v29 = vmul.f32 %v2204_v56, %v2750_v16 }
 0x5d1   :  { %v853_v0 = vadd.f32 1.0, %v2206_v57 }
 0x5d2   :  { %v769_v10 = vadd.f32 %v768_v63, %v682_v58 }
 0x5d3   :  { %2207 = vrcp.f32 %v853_v0 }
 0x5d4   :  { %2209 = vtanh.f32 %v769_v10 }
 0x5dd   :  { %v2208_v27 = vpop.eup %2207 }
 0x5de   :  { %v2210_v4 = vpop.eup %2209  ;;  %v856_v9 = vmul.f32 %v2208_v27, %v848_v26  ;;  %v859_v36 = vsub.f32 1.0, %v2208_v27  ;;  %v865_v38 = vmul.f32 %v2208_v27, %v2755_v33 }
 0x5df   :  { %773 = vrot.lane.b32.xlu1 %v2210_v4, %s2426_s2 }
 0x5e0   :  { %v857_v13 = vadd.f32 %v2658_v34, %v856_v9 }
 0x5e2   :  { %2211 = vtanh.f32 %v857_v13 }
 0x5ec   :  { %v2212_v18 = vpop.eup %2211 }
 0x5ed   :  { %861 = vrot.lane.b32.xlu0 %v2212_v18, %s2426_s2 }
 0x651   :  { %v774_v22 = vpop.permute.xlu1 %773 }
 0x652   :  { %v776_v6 = vmul.f32 %v774_v22, %v771_v20 }
 0x654   :  { %v2801_v17 = vadd.f32 %v777_v29, %v776_v6 }
 0x656   :  { %944 = vrot.lane.b32.xlu1 %v2801_v17, %s2426_s2 }
 0x65f   :  { %v862_v37 = vpop.permute.xlu0 %861 }
 0x660   :  { %v864_v39 = vmul.f32 %v862_v37, %v859_v36 }
 0x662   :  { %v2806_v41 = vadd.f32 %v865_v38, %v864_v39 }
 0x664   :  { %868 = vrot.lane.b32.xlu0 %v2806_v41, %s2426_s2 }
 0x6c8   :  { %v945_v42 = vpop.permute.xlu1 %944 }
 0x6c9   :  { %1797 = vmatmul.mubr.msk.f32.vlgmr.msra.gmra.mrb[8].mxu0 %vm201_vm0, %v945_v42 }
 0x6ca   :  { %2038 = vmatpush1.bf16.msra.mxu0 %v2663_v44  ;;  %1195 = vmatprep.mubr.f32.mxu0 %v2425_v31 }
 0x6cb   :  { %2040 = vmatprep.subr.bf16.mxu0 %v2665_v45 }
 0x6ce   :  { %2042 = vmatpush1.bf16.msra.mxu0 %v2670_v50 }
 0x6cf   :  { %2044 = vmatprep.subr.bf16.mxu0 %v2674_v51 }
 0x6d2   :  { %2046 = vmatpush1.bf16.msra.mxu0 %v2678_v59 }
 0x6d3   :  { %2048 = vmatprep.subr.bf16.mxu0 %v2683_v62 }
 0x6d6   :  { %v869_v16 = vpop.permute.xlu0 %868  ;;  %2050 = vmatpush1.bf16.msra.mxu0 %v2687_v1 }
 0x6d7   :  { %1796 = vmatmul.mubr.msk.f32.vlgmr.msra.gmra.mrb[6].mxu1 %vm201_vm0, %v869_v16  ;;  %2068 = vmatprep.subr.bf16.mxu0 %v2576_v5 }
 0x6d8   :  { %2022 = vmatpush1.bf16.msra.mxu1 %v2578_v8  ;;  %1102 = vmatprep.mubr.f32.mxu1 %v2425_v31 }
 0x6d9   :  { %2024 = vmatprep.subr.bf16.mxu1 %v2581_v11 }
 0x6dc   :  { %2026 = vmatpush1.bf16.msra.mxu1 %v2584_v14 }
 0x6dd   :  { %2028 = vmatprep.subr.bf16.mxu1 %v2586_v19 }
 0x6e0   :  { %2030 = vmatpush1.bf16.msra.mxu1 %v2590_v24 }
 0x6e1   :  { %2032 = vmatprep.subr.bf16.mxu1 %v2593_v25 }
 0x6e4   :  { %2034 = vmatpush1.bf16.msra.mxu1 %v2596_v30 }
 0x6e5   :  { %2052 = vmatprep.subr.bf16.mxu1 %v2600_v32 }
 0x6e7   :  { %1799 = vmatmul.mubr.msk.f32.vlgmr.msra.gmra.mrb[8].mxu1 %vm201_vm0, %v869_v16 }
 0x6e8   :  { %2054 = vmatpush1.bf16.msra.mxu1 %v2608_v53  ;;  %1271 = vmatprep.mubr.f32.mxu1 %v2425_v31 }
 0x6e9   :  { %2056 = vmatprep.subr.bf16.mxu1 %v2610_v55 }
 0x6ec   :  { %2058 = vmatpush1.bf16.msra.mxu1 %v2615_v60 }
 0x6ed   :  { %2060 = vmatprep.subr.bf16.mxu1 %v2619_v61 }
 0x6f0   :  { %2062 = vmatpush1.bf16.msra.mxu1 %v2622_v2 }
 0x6f1   :  { %2064 = vmatprep.subr.bf16.mxu1 %v2625_v3 }
 0x6f4   :  { %2066 = vmatpush1.bf16.msra.mxu1 %v2628_v7 }
 0x6f5   :  { %2084 = vmatprep.subr.bf16.mxu1 %v2661_v40 }
 0x79c   :  { %v1014_v5 = vpop.f32.mrb[8].mxu0 }
 0x79d   :  { %v1016_v33 = vpop.f32.mrb[9].mxu0 }
 0x79e   :  { %v1026_v40 = vadd.f32 %v2736_v12, %v1016_v33 }
 0x7aa   :  { %v938_v43 = vpop.f32.mrb[6].mxu1 }
 0x7ab   :  { %v939_v23 = vadd.f32 %v938_v43, %v2728_v21  ;;  %v940_v47 = vpop.f32.mrb[7].mxu1 }
 0x7ac   :  { %v941_v26 = vadd.f32 %v940_v47, %v2740_v46 }
 0x7ad   :  { %v1019_v48 = vadd.f32 %v1014_v5, %v939_v23 }
 0x7af   :  { %v1798_v49 = vmul.f32 -1.442695, %v1019_v48 }
 0x7b1   :  { %2213 = vpow2.f32 %v1798_v49 }
 0x7ba   :  { %v1104_v52 = vpop.f32.mrb[8].mxu1 }
 0x7bb   :  { %v2214_v54 = vpop.eup %2213  ;;  %v1105_v56 = vadd.f32 %v1104_v52, %v2642_v15  ;;  %v1106_v57 = vpop.f32.mrb[9].mxu1 }
 0x7bc   :  { %v1023_v58 = vadd.f32 1.0, %v2214_v54  ;;  %v1107_v13 = vadd.f32 %v1106_v57, %v2652_v28 }
 0x7bd   :  { %v1800_v63 = vmul.f32 -1.442695, %v1105_v56 }
 0x7be   :  { %2215 = vrcp.f32 %v1023_v58 }
 0x7bf   :  { %2217 = vpow2.f32 %v1800_v63  ;;  %v1579_v63 = vld [vmem:[#allocation11 + $0x80] sm:$0xff] }
 0x7c8   :  { %v2216_v0 = vpop.eup %2215 }
 0x7c9   :  { %v2218_v10 = vpop.eup %2217  ;;  %v1027_v27 = vmul.f32 %v2216_v0, %v1026_v40  ;;  %v1030_v36 = vsub.f32 1.0, %v2216_v0  ;;  %v1036_v38 = vmul.f32 %v2216_v0, %v2801_v17  ;;  %v1580_v40 = vld [vmem:[#allocation11 + $0x88] sm:$0xff] }
 0x7ca   :  { %v1112_v4 = vadd.f32 1.0, %v2218_v10 }
 0x7cb   :  { %v1028_v9 = vadd.f32 %v1027_v27, %v941_v26 }
 0x7cc   :  { %2219 = vrcp.f32 %v1112_v4 }
 0x7cd   :  { %2221 = vtanh.f32 %v1028_v9 }
 0x7d6   :  { %v2220_v18 = vpop.eup %2219 }
 0x7d7   :  { %v2222_v20 = vpop.eup %2221  ;;  %v1115_v22 = vmul.f32 %v2220_v18, %v1107_v13  ;;  %v1118_v16 = vsub.f32 1.0, %v2220_v18  ;;  %v1124_v33 = vmul.f32 %v2220_v18, %v2806_v41  ;;  %v1563_v13 = vld [vmem:[#allocation11] sm:$0xff]  ;;  %v1564_v18 = vld [vmem:[#allocation11 + $0x8] sm:$0xff] }
 0x7d8   :  { %1032 = vrot.lane.b32.xlu1 %v2222_v20, %s2426_s2  ;;  %v1581_v20 = vld [vmem:[#allocation11 + $0x90] sm:$0xff] }
 0x7d9   :  { %v1116_v29 = vadd.f32 %v2658_v34, %v1115_v22  ;;  %v1582_v22 = vld [vmem:[#allocation11 + $0x98] sm:$0xff] }
 0x7db   :  { %2223 = vtanh.f32 %v1116_v29  ;;  %v2117_v29 = vpack.c.bf16 %v1564_v18, %v1563_v13 }
 0x7e5   :  { %v2224_v6 = vpop.eup %2223 }
 0x7e6   :  { %1120 = vrot.lane.b32.xlu0 %v2224_v6, %s2426_s2  ;;  %v2119_v6 = vpack.c.bf16 %v1582_v22, %v1581_v20 }
 0x84a   :  { %v1033_v37 = vpop.permute.xlu1 %1032 }
 0x84b   :  { %v1035_v39 = vmul.f32 %v1033_v37, %v1030_v36  ;;  %v1565_v36 = vld [vmem:[#allocation11 + $0x10] sm:$0xff]  ;;  %v1566_v37 = vld [vmem:[#allocation11 + $0x18] sm:$0xff] }
 0x84d   :  { %v2849_v42 = vadd.f32 %v1036_v38, %v1035_v39  ;;  %v1583_v39 = vld [vmem:[#allocation11 + $0xa0] sm:$0xff] }
 0x84f   :  { %1203 = vrot.lane.b32.xlu1 %v2849_v42, %s2426_s2 }
 0x858   :  { %v1121_v5 = vpop.permute.xlu0 %1120 }
 0x859   :  { %v1123_v43 = vmul.f32 %v1121_v5, %v1118_v16  ;;  %v2121_v5 = vpack.c.bf16 %v1566_v37, %v1565_v36  ;;  %v1595_v36 = vld [vmem:[#allocation11 + $0x100] sm:$0xff]  ;;  %v1597_v37 = vld [vmem:[#allocation11 + $0x110] sm:$0xff] }
 0x85b   :  { %v2854_v23 = vadd.f32 %v1124_v33, %v1123_v43  ;;  %v1567_v43 = vld [vmem:[#allocation11 + $0x20] sm:$0xff] }
 0x85d   :  { %1127 = vrot.lane.b32.xlu0 %v2854_v23, %s2426_s2 }
 0x8c1   :  { %v2858_v47 = vpop.permute.xlu1 %1203 }
 0x8c2   :  { %1802 = vmatmul.mubr.msk.f32.vlgmr.msra.gmra.mrb[10].mxu1 %vm201_vm0, %v2858_v47 }
 0x8c3   :  { %2086 = vmatpush1.bf16.msra.mxu1 %v2663_v44  ;;  %1454 = vmatprep.mubr.f32.mxu1 %v2425_v31 }
 0x8c4   :  { %2088 = vmatprep.subr.bf16.mxu1 %v2665_v45 }
 0x8c7   :  { %2090 = vmatpush1.bf16.msra.mxu1 %v2670_v50 }
 0x8c8   :  { %2092 = vmatprep.subr.bf16.mxu1 %v2674_v51 }
 0x8cb   :  { %2094 = vmatpush1.bf16.msra.mxu1 %v2678_v59 }
 0x8cc   :  { %2096 = vmatprep.subr.bf16.mxu1 %v2683_v62 }
 0x8cf   :  { %v1128_v41 = vpop.permute.xlu0 %1127  ;;  %2098 = vmatpush1.bf16.msra.mxu1 %v2687_v1 }
 0x8d0   :  { %1801 = vmatmul.mubr.msk.f32.vlgmr.msra.gmra.mrb[10].mxu0 %vm201_vm0, %v1128_v41 }
 0x8d1   :  { %2070 = vmatpush1.bf16.msra.mxu0 %v2578_v8  ;;  %1361 = vmatprep.mubr.f32.mxu0 %v2425_v31 }
 0x8d2   :  { %2072 = vmatprep.subr.bf16.mxu0 %v2581_v11 }
 0x8d5   :  { %2074 = vmatpush1.bf16.msra.mxu0 %v2584_v14 }
 0x8d6   :  { %2076 = vmatprep.subr.bf16.mxu0 %v2586_v19 }
 0x8d9   :  { %2078 = vmatpush1.bf16.msra.mxu0 %v2590_v24 }
 0x8da   :  { %2080 = vmatprep.subr.bf16.mxu0 %v2593_v25 }
 0x8dd   :  { %2082 = vmatpush1.bf16.msra.mxu0 %v2596_v30 }
 0x8de   :  { %2100 = vmatprep.subr.bf16.mxu0 %v2600_v32 }
 0x8e0   :  { %1804 = vmatmul.mubr.msk.f32.vlgmr.msra.gmra.mrb[12].mxu0 %vm201_vm0, %v1128_v41  ;;  %v1585_v41 = vld [vmem:[#allocation11 + $0xb0] sm:$0xff] }
 0x8e1   :  { %2102 = vmatpush1.bf16.msra.mxu0 %v2608_v53  ;;  %1530 = vmatprep.mubr.f32.mxu0 %v2425_v31 }
 0x8e2   :  { %2104 = vmatprep.subr.bf16.mxu0 %v2610_v55 }
 0x8e5   :  { %2106 = vmatpush1.bf16.msra.mxu0 %v2615_v60 }
 0x8e6   :  { %2108 = vmatprep.subr.bf16.mxu0 %v2619_v61 }
 0x8e9   :  { %2110 = vmatpush1.bf16.msra.mxu0 %v2622_v2 }
 0x8ea   :  { %2112 = vmatprep.subr.bf16.mxu0 %v2625_v3 }
 0x8ed   :  { %2114 = vmatpush1.bf16.msra.mxu0 %v2628_v7 }
 0x995   :  { %v1273_v8 = vpop.f32.mrb[10].mxu1 }
 0x996   :  { %v1275_v11 = vpop.f32.mrb[11].mxu1 }
 0x997   :  { %v1285_v3 = vadd.f32 %v2736_v12, %v1275_v11 }
 0x9a3   :  { %v1197_v14 = vpop.f32.mrb[10].mxu0 }
 0x9a4   :  { %v1198_v19 = vadd.f32 %v1197_v14, %v2728_v21  ;;  %v1199_v24 = vpop.f32.mrb[11].mxu0 }
 0x9a5   :  { %v1200_v45 = vadd.f32 %v1199_v24, %v2740_v46  ;;  %v1570_v24 = vld [vmem:[#allocation11 + $0x38] sm:$0xff] }
 0x9a6   :  { %v1278_v25 = vadd.f32 %v1273_v8, %v1198_v19  ;;  %v1586_v8 = vld [vmem:[#allocation11 + $0xb8] sm:$0xff]  ;;  %v1569_v19 = vld [vmem:[#allocation11 + $0x30] sm:$0xff] }
 0x9a7   :  { %v2127_v14 = vpack.c.bf16 %v1586_v8, %v1585_v41 }
 0x9a8   :  { %v1803_v30 = vmul.f32 -1.442695, %v1278_v25  ;;  %v1587_v25 = vld [vmem:[#allocation11 + $0xc0] sm:$0xff] }
 0x9aa   :  { %2225 = vpow2.f32 %v1803_v30  ;;  %v1588_v30 = vld [vmem:[#allocation11 + $0xc8] sm:$0xff] }
 0x9b3   :  { %v1363_v32 = vpop.f32.mrb[12].mxu0 }
 0x9b4   :  { %v2226_v53 = vpop.eup %2225  ;;  %v1364_v55 = vadd.f32 %v1363_v32, %v2642_v15  ;;  %v1365_v60 = vpop.f32.mrb[13].mxu0  ;;  %v2129_v32 = vpack.c.bf16 %v1570_v24, %v1569_v19 }
 0x9b5   :  { %v1282_v61 = vadd.f32 1.0, %v2226_v53  ;;  %v1366_v62 = vadd.f32 %v1365_v60, %v2652_v28  ;;  %v2115_v28 = vpack.c.bf16 %v1580_v40, %v1579_v63  ;;  %v1571_v53 = vld [vmem:[#allocation11 + $0x40] sm:$0xff]  ;;  %v1589_v60 = vld [vmem:[#allocation11 + $0xd0] sm:$0xff] }
 0x9b6   :  { %v1805_v2 = vmul.f32 -1.442695, %v1364_v55  ;;  %v1572_v55 = vld [vmem:[#allocation11 + $0x48] sm:$0xff] }
 0x9b7   :  { %2227 = vrcp.f32 %v1282_v61  ;;  %2116 = vmatprep.subr.bf16.mxu1 %v2115_v28  ;;  %v1590_v61 = vld [vmem:[#allocation11 + $0xd8] sm:$0xff] }
 0x9b8   :  { %2229 = vpow2.f32 %v1805_v2  ;;  %v2133_v2 = vpack.c.bf16 %v1572_v55, %v1571_v53 }
 0x9c1   :  { %v2228_v7 = vpop.eup %2227 }
 0x9c2   :  { %v2230_v44 = vpop.eup %2229  ;;  %v1286_v50 = vmul.f32 %v2228_v7, %v1285_v3  ;;  %v1289_v54 = vsub.f32 1.0, %v2228_v7  ;;  %v1295_v57 = vmul.f32 %v2228_v7, %v2849_v42  ;;  %v1584_v42 = vld [vmem:[#allocation11 + $0xa8] sm:$0xff]  ;;  %v2135_v3 = vpack.c.bf16 %v1590_v61, %v1589_v60  ;;  %v1573_v7 = vld [vmem:[#allocation11 + $0x50] sm:$0xff] }
 0x9c3   :  { %v1371_v51 = vadd.f32 1.0, %v2230_v44  ;;  %v2123_v33 = vpack.c.bf16 %v1584_v42, %v1583_v39  ;;  %v1574_v44 = vld [vmem:[#allocation11 + $0x58] sm:$0xff] }
 0x9c4   :  { %v1287_v59 = vadd.f32 %v1286_v50, %v1200_v45  ;;  %v1591_v45 = vld [vmem:[#allocation11 + $0xe0] sm:$0xff]  ;;  %v1592_v50 = vld [vmem:[#allocation11 + $0xe8] sm:$0xff]  ;;  %v1598_v42 = vld [vmem:[#allocation11 + $0x118] sm:$0xff] }
 0x9c5   :  { %2231 = vrcp.f32 %v1371_v51  ;;  %v2137_v51 = vpack.c.bf16 %v1574_v44, %v1573_v7 }
 0x9c6   :  { %2233 = vtanh.f32 %v1287_v59  ;;  %v2139_v59 = vpack.c.bf16 %v1592_v50, %v1591_v45 }
 0x9cf   :  { %v2232_v1 = vpop.eup %2231 }
 0x9d0   :  { %v2234_v15 = vpop.eup %2233  ;;  %v1374_v48 = vmul.f32 %v2232_v1, %v1366_v62  ;;  %v1377_v10 = vsub.f32 1.0, %v2232_v1  ;;  %v1383_v26 = vmul.f32 %v2232_v1, %v2854_v23  ;;  %v1568_v23 = vld [vmem:[#allocation11 + $0x28] sm:$0xff]  ;;  %v1575_v62 = vld [vmem:[#allocation11 + $0x60] sm:$0xff] }
 0x9d1   :  { %1291 = vrot.lane.b32.xlu1 %v2234_v15, %s2426_s2  ;;  %v2125_v11 = vpack.c.bf16 %v1568_v23, %v1567_v43  ;;  %v1576_v1 = vld [vmem:[#allocation11 + $0x68] sm:$0xff]  ;;  %v1593_v15 = vld [vmem:[#allocation11 + $0xf0] sm:$0xff]  ;;  %v1602_v23 = vld [vmem:[#allocation11 + $0x138] sm:$0xff] }
 0x9d2   :  { %v1375_v49 = vadd.f32 %v2658_v34, %v1374_v48  ;;  %v1594_v48 = vld [vmem:[#allocation11 + $0xf8] sm:$0xff]  ;;  %v1601_v43 = vld [vmem:[#allocation11 + $0x130] sm:$0xff] }
 0x9d3   :  { %v2157_v41 = vpack.c.bf16 %v1602_v23, %v1601_v43 }
 0x9d4   :  { %2235 = vtanh.f32 %v1375_v49  ;;  %v2141_v49 = vpack.c.bf16 %v1576_v1, %v1575_v62 }
 0x9de   :  { %v2236_v52 = vpop.eup %2235 }
 0x9df   :  { %1379 = vrot.lane.b32.xlu0 %v2236_v52, %s2426_s2  ;;  %v2143_v52 = vpack.c.bf16 %v1594_v48, %v1593_v15 }
 0xa43   :  { %v1292_v56 = vpop.permute.xlu1 %1291 }
 0xa44   :  { %v1294_v58 = vmul.f32 %v1292_v56, %v1289_v54  ;;  %v1577_v54 = vld [vmem:[#allocation11 + $0x70] sm:$0xff]  ;;  %v1578_v56 = vld [vmem:[#allocation11 + $0x78] sm:$0xff] }
 0xa46   :  { %v2898_v0 = vadd.f32 %v1295_v57, %v1294_v58  ;;  %v2145_v57 = vpack.c.bf16 %v1578_v56, %v1577_v54  ;;  %v1561_v58 = vsel %vm201_vm0, %v2759_v35, %v2801_v17 }
 0xa48   :  { %1462 = vrot.lane.b32.xlu1 %v2898_v0, %s2426_s2  ;;  %v1562_v16 = vsel %vm201_vm0, %v2858_v47, %v2898_v0  ;;  %v2131_v47 = vpack.c.bf16 %v1588_v30, %v1587_v25  ;;  %v1809_v25 = vld [vmem:[%s2946_s11] ss:$0 sm:$0xff] }
 0xa51   :  { %v1380_v34 = vpop.permute.xlu0 %1379 }
 0xa52   :  { %v1382_v27 = vmul.f32 %v1380_v34, %v1377_v10 }
 0xa54   :  { %v1384_v4 = vadd.f32 %v1383_v26, %v1382_v27 }
 0xa56   :  { %1386 = vrot.lane.b32.xlu0 %v1384_v4, %s2426_s2 }
 0xaba   :  { %v1463_v9 = vpop.permute.xlu1 %1462 }
 0xabb   :  { %1807 = vmatmul.mubr.msk.f32.vlgmr.msra.gmra.mrb[14].mxu0 %vm201_vm0, %v1463_v9 }
 0xabc   :  { %1872 = vmatprep.mubr.msk.f32.mxu0 %vm2428_vm1, %v2425_v31 }
 0xac8   :  { %v1387_v38 = vpop.permute.xlu0 %1386 }
 0xac9   :  { %1806 = vmatmul.mubr.msk.f32.vlgmr.msra.gmra.mrb[12].mxu1 %vm201_vm0, %v1387_v38  ;;  %v2427_v38 = vmov 0.0|0.0  }
 0xaca   :  { %2118 = vmatpush3.bf16.msra.mxu1 %v2117_v29  ;;  %1676 = vmatprep.mubr.f32.mxu1 %v1562_v16  ;;  %v1600_v16 = vld [vmem:[#allocation11 + $0x128] sm:$0xff] }
 0xacb   :  { %2120 = vmatprep.subr.bf16.mxu1 %v2119_v6  ;;  %2147 = vmatprep.subr.bf16.mxu0 %v2427_v38 }
 0xace   :  { %2122 = vmatpush3.bf16.msra.mxu1 %v2121_v5 }
 0xacf   :  { %2124 = vmatprep.subr.bf16.mxu1 %v2123_v33 }
 0xad2   :  { %2126 = vmatpush3.bf16.msra.mxu1 %v2125_v11 }
 0xad3   :  { %2128 = vmatprep.subr.bf16.mxu1 %v2127_v14 }
 0xad6   :  { %2130 = vmatpush3.bf16.msra.mxu1 %v2129_v32 }
 0xad7   :  { %2132 = vmatprep.subr.bf16.mxu1 %v2131_v47 }
 0xada   :  { %2134 = vmatpush3.bf16.msra.mxu1 %v2133_v2 }
 0xadb   :  { %2136 = vmatprep.subr.bf16.mxu1 %v2135_v3 }
 0xade   :  { %2138 = vmatpush3.bf16.msra.mxu1 %v2137_v51 }
 0xadf   :  { %2140 = vmatprep.subr.bf16.mxu1 %v2139_v59 }
 0xae2   :  { %2142 = vmatpush3.bf16.msra.mxu1 %v2141_v49 }
 0xae3   :  { %2144 = vmatprep.subr.bf16.mxu1 %v2143_v52 }
 0xae6   :  { %2146 = vmatpush3.bf16.msra.mxu1 %v2145_v57 }
 0xae9   :  { %1677 = vmatmul.mubr.f32.vlgmr.msra.gmra.mrb[14].mxu1 %v1561_v58 }
 0xb8e   :  { %v1532_v63 = vpop.f32.mrb[14].mxu0 }
 0xb8f   :  { %v1534_v40 = vpop.f32.mrb[15].mxu0 }
 0xb90   :  { %v1544_v13 = vadd.f32 %v2736_v12, %v1534_v40  ;;  %v2151_v12 = vpack.c.bf16 %v1598_v42, %v1597_v37 }
 0xb9c   :  { %v1456_v28 = vpop.f32.mrb[12].mxu1 }
 0xb9d   :  { %v1457_v10 = vadd.f32 %v1456_v28, %v2728_v21  ;;  %v1458_v34 = vpop.f32.mrb[13].mxu1  ;;  %v1596_v21 = vld [vmem:[#allocation11 + $0x108] sm:$0xff] }
 0xb9e   :  { %v1459_v20 = vadd.f32 %v1458_v34, %v2740_v46  ;;  %v2148_v39 = vpack.c.bf16 %v1596_v21, %v1595_v36  ;;  %v1599_v46 = vld [vmem:[#allocation11 + $0x120] sm:$0xff] }
 0xb9f   :  { %v1537_v26 = vadd.f32 %v1532_v63, %v1457_v10  ;;  %v2154_v5 = vpack.c.bf16 %v1600_v16, %v1599_v46 }
 0xba0   :  { %2149 = vmatpush3.bf16.msra.mxu0 %v2148_v39 }
 0xba1   :  { %v1808_v27 = vmul.f32 -1.442695, %v1537_v26  ;;  %2150 = vmatprep.subr.bf16.mxu0 %v2427_v38 }
 0xba3   :  { %2237 = vpow2.f32 %v1808_v27 }
 0xba4   :  { %2152 = vmatpush3.bf16.msra.mxu0 %v2151_v12 }
 0xba5   :  { %2153 = vmatprep.subr.bf16.mxu0 %v2427_v38 }
 0xba8   :  { %2155 = vmatpush3.bf16.msra.mxu0 %v2154_v5 }
 0xba9   :  { %2156 = vmatprep.subr.bf16.mxu0 %v2427_v38 }
 0xbac   :  { %2158 = vmatpush3.bf16.msra.mxu0 %v2157_v41 }
 0xbad   :  { %v2238_v4 = vpop.eup %2237 }
 0xbae   :  { %v1541_v9 = vadd.f32 1.0, %v2238_v4 }
 0xbb0   :  { %2239 = vrcp.f32 %v1541_v9 }
 0xbba   :  { %v2240_v18 = vpop.eup %2239 }
 0xbbb   :  { %v1545_v22 = vmul.f32 %v2240_v18, %v1544_v13  ;;  %v1548_v8 = vsub.f32 1.0, %v2240_v18  ;;  %v1554_v31 = vmul.f32 %v2240_v18, %v2898_v0 }
 0xbbc   :  { %v1844_v35 = vpop.f32.mrb[14].mxu1 }
 0xbbd   :  { %v1546_v17 = vadd.f32 %v1545_v22, %v1459_v20  ;;  %v1845_v29 = vpop.f32.mrb[15].mxu1 }
 0xbbe   :  { %v1846_v6 = vadd.f32 %v1845_v29, %v1844_v35 }
 0xbbf   :  { %2241 = vtanh.f32 %v1546_v17 }
 0xbc0   :  { %v1679_v30 = vadd.f32 %v1846_v6, %v1809_v25 }
 0xbc9   :  { %v2242_v33 = vpop.eup %2241 }
 0xbca   :  { %1550 = vrot.lane.b32.xlu0 %v2242_v33, %s2426_s2 }
 0xc3c   :  { %v1551_v11 = vpop.permute.xlu0 %1550 }
 0xc3d   :  { %v1553_v14 = vmul.f32 %v1551_v11, %v1548_v8 }
 0xc3f   :  { %v1555_v19 = vadd.f32 %v1554_v31, %v1553_v14 }
 0xc41   :  { %1559 = vrot.lane.b32.xlu1 %v1555_v19, %s2426_s2 }
 0xcb3   :  { %v1560_v24 = vpop.permute.xlu1 %1559 }
 0xcb4   :  { %1873 = vmatmul.mubr.msk.f32.vlgmr.msra.gmra.mrb[16].mxu0 %vm201_vm0, %v1560_v24 }
 0xd87   :  { %v1748_v32 = vpop.f32.mrb[16].mxu0 }
 0xd88   :  { %v1749_v47 = vadd.f32 %v1748_v32, %v1679_v30  ;;  %v1874_v53 = vpop.f32.mrb[17].mxu0 }
 0xd8a   :  { %v1811_v55 = vmul.f32 -1.442695, %v1749_v47 }
 0xd8c   :  { %2243 = vpow2.f32 %v1811_v55 }
 0xd96   :  { %v2244_v60 = vpop.eup %2243 }
 0xd97   :  { %v1755_v61 = vadd.f32 1.0, %v2244_v60 }
 0xd99   :  { %2245 = vrcp.f32 %v1755_v61 }
 0xda3   :  { %v2246_v0 = vpop.eup %2245 }
 0xda4   :  { %1758 = vst [vmem:[#allocation13] sm:$0x3] %v2246_v0 }
 0xda5   :  { %2390 = shalt.err (!%p2387_p10)
}
 0xda6   :  { %s2391_s30 = scalar_lea.hbm %s2947_s12, 32 }
 0xda7   :  { %p2392_p11 = scmp.ne.s32.totalorder %s2947_s12, %s2391_s30  ;;  %p2395_p12 = scmp.lt.u32.totalorder %s2391_s30, %s2947_s12 }
 0xda9   :  { %p2397_p13 = pnand %p2395_p12, %p2392_p11 }
 0xdab   :  { %2400 = shalt.err (!%p2397_p13)
}
 0xdac   :  { %1768 = dma.vmem_to_hbm [thread:$0]  %s1766_s24, 32, %s2947_s12, [#allocation4]  }
 0xdad   :  { %2409 = dma.done.wait [#allocation4], 32  }
 0xdae   :  { %2410 = vsyncadd [#allocation4], 4294967264 }
 0xdaf   :  { %1772 = vsyncpa [#allocation3], 1 }
 0xdb0   :  { %1773 = vsyncpa [#allocation6], 1 }
 0xdb1   :  { %1774 = vsyncpa [#allocation9], 1 }
 0xdb2   :  { %1775 = vsyncpa [#allocation12], 1 }
 0xdb3   :  { %1776 = vsyncpa [#allocation4], 1 }

</bundles_post_ra>
